<compile_context>
chip_gen: v6e
topology: v6e:2x2x1
jax: 0.10.0
libtpu: 0.0.40
codegen_flags: <defaults>
</compile_context>

<pallas_src>
import functools
import math

import jax
import jax.numpy as jnp
from jax.experimental import pallas as pl
from jax.experimental.pallas import tpu as pltpu  # noqa: F401  (TPU backend assumed)

H_AMAP = 7
W_AMAP = 7
NUM_CLASSES = 20
IN_DIM = 1280
HIDDEN_DIM = 128
ANCHOR_LIST = jnp.array(
    [[1.0, 1], [2, 2], [3, 3], [4, 4], [5, 5], [2, 3], [3, 2], [3, 5], [5, 3]],
    dtype=jnp.float32,
)
NUM_ANCHORS = ANCHOR_LIST.shape[0]
OUT_DIM = 5 * NUM_ANCHORS + NUM_CLASSES  # 65
LANE = 128
K_PAD = 8  # backbone projection K=3 padded to 8 (avoids a 3-lane MXU operand)


def _round_up(x, m):
    return (x + m - 1) // m * m


# ------------------------------------------------------------------
# Pallas kernels
# ------------------------------------------------------------------
def _prednet_kernel(x_ref, wf_ref, bf_ref, w1_ref, b1_ref, w2_ref, b2_ref, o_ref):
    """Fused backbone projection + PredictionNetwork (two 1x1 convs as matmuls).

    x: (Mpad, 8) f32, wf: (8, 1280) f32, w1: (1280, 128) bf16, w2: (128, 128) bf16.
    Intermediates (feat, hid) stay in VMEM; single lane-dense (Mpad, 128) output.
    """
    feat = jnp.dot(x_ref[...], wf_ref[...], preferred_element_type=jnp.float32)
    feat = feat + bf_ref[...]
    hid = jnp.dot(feat.astype(jnp.bfloat16), w1_ref[...],
                  preferred_element_type=jnp.float32)
    hid = hid + b1_ref[...]
    hid = jnp.where(hid >= 0.0, hid, 0.01 * hid)          # LeakyReLU(0.01) in f32
    out = jnp.dot(hid.astype(jnp.bfloat16), w2_ref[...],
                  preferred_element_type=jnp.float32)
    o_ref[...] = out + b2_ref[...]


def prediction_network(pooled_flat, params):
    """pooled_flat: (M0, 3) pooled backbone input -> (M0, 128) head output (cols>=65 are 0)."""
    m0 = pooled_flat.shape[0]
    m_pad = _round_up(max(m0, LANE), LANE)
    x_pad = jnp.zeros((m_pad, K_PAD), jnp.float32).at[:m0, :3].set(pooled_flat)
    wf_pad = jnp.zeros((K_PAD, IN_DIM), jnp.float32).at[:3].set(params["wf"])
    bf = params["bf"].reshape(1, IN_DIM)
    # bf16 MXU inputs, f32 master weights in the wrapper, f32 accumulation.
    w1 = params["w1"].astype(jnp.bfloat16)
    b1 = params["b1"].reshape(1, HIDDEN_DIM)
    w2_pad = (jnp.zeros((HIDDEN_DIM, LANE), jnp.float32)
              .at[:, :OUT_DIM].set(params["w2"])).astype(jnp.bfloat16)
    b2_pad = jnp.zeros((1, LANE), jnp.float32).at[0, :OUT_DIM].set(params["b2"])
    out = pl.pallas_call(
        _prednet_kernel,
        out_shape=jax.ShapeDtypeStruct((m_pad, LANE), jnp.float32),
    )(x_pad, wf_pad, bf, w1, b1, w2_pad, b2_pad)
    return out[:m0]


def _iou_kernel(prop_ref, bbox_ref, iou_ref):
    """Whole-batch IoU. proposals (B,4,AHW) [AHW on lanes], bboxes (B,N,5) -> (B,N,AHW)."""
    p = prop_ref[...]
    bb = bbox_ref[...]
    px_tl = p[:, 0:1, :]
    py_tl = p[:, 1:2, :]
    px_br = p[:, 2:3, :]
    py_br = p[:, 3:4, :]
    bx_tl = bb[:, :, 0:1]
    by_tl = bb[:, :, 1:2]
    bx_br = bb[:, :, 2:3]
    by_br = bb[:, :, 3:4]
    p_area = (px_br - px_tl) * (py_br - py_tl)          # (B, 1, AHW)
    b_area = (bx_br - bx_tl) * (by_br - by_tl)          # (B, N, 1)
    left = jnp.maximum(px_tl, bx_tl)
    right = jnp.minimum(px_br, bx_br)
    top = jnp.maximum(py_tl, by_tl)
    bottom = jnp.minimum(py_br, by_br)
    inter = jnp.maximum(right - left, 0.0) * jnp.maximum(bottom - top, 0.0)
    union = p_area + b_area - inter
    iou_ref[...] = inter / jnp.maximum(union, 1e-8)     # eps guards padded/degenerate boxes


def iou_pallas(anchors_cf, bboxes):
    """anchors_cf: (B, 4, A*H*W), bboxes: (B, N, 5) -> iou (B, N, A*H*W)."""
    B, _, ahw = anchors_cf.shape
    N = bboxes.shape[1]
    return pl.pallas_call(
        _iou_kernel,
        out_shape=jax.ShapeDtypeStruct((B, N, ahw), jnp.float32),
    )(anchors_cf, bboxes)


def _loss_kernel(conf_ref, conf_gt_ref, off_ref, off_gt_ref, logit_ref, onehot_ref,
                 o_ref, *, conf_scale, reg_scale, cls_scale):
    """Fused conf-SSE + bbox-SSE + cross-entropy reduction -> 128-lane scalar slab."""
    dc = conf_ref[...] - conf_gt_ref[...]
    conf_loss = jnp.sum(dc * dc) * conf_scale
    dr = off_ref[...] - off_gt_ref[...]
    reg_loss = jnp.sum(dr * dr) * reg_scale
    logits = logit_ref[...]
    mx = jnp.max(logits, axis=-1, keepdims=True)
    lse = jnp.log(jnp.sum(jnp.exp(logits - mx), axis=-1, keepdims=True)) + mx
    tgt = jnp.sum(onehot_ref[...] * logits, axis=-1, keepdims=True)
    cls_loss = jnp.sum(lse - tgt) * cls_scale
    total = conf_loss + reg_loss + cls_loss
    o_ref[...] = jnp.zeros((1, LANE), jnp.float32) + total


def fused_loss_pallas(conf, conf_gt, off, off_gt, logits, onehot,
                      *, conf_scale, reg_scale, cls_scale):
    out = pl.pallas_call(
        functools.partial(_loss_kernel, conf_scale=conf_scale,
                          reg_scale=reg_scale, cls_scale=cls_scale),
        out_shape=jax.ShapeDtypeStruct((1, LANE), jnp.float32),
    )(conf, conf_gt, off, off_gt, logits, onehot)
    return out[0, 0]


# ------------------------------------------------------------------
# Glue (anchor generation / anchor matching / gathers)
# ------------------------------------------------------------------
def generate_grid(batch_size, h=H_AMAP, w=W_AMAP):
    # TODO(synk): GenerateGrid was not provided; standard reconstruction (cell centers).
    ws = jnp.arange(w, dtype=jnp.float32) + 0.5
    hs = jnp.arange(h, dtype=jnp.float32) + 0.5
    gx = jnp.broadcast_to(ws[None, :], (h, w))
    gy = jnp.broadcast_to(hs[:, None], (h, w))
    grid = jnp.stack([gx, gy], axis=-1)                          # (H, W, 2)
    return jnp.broadcast_to(grid[None], (batch_size, h, w, 2))


def generate_anchors(anc, grid):
    """GenerateAnchor, in two layouts: (B,4,A*H*W) lane-dense and (B*A*H*W,4) row-major."""
    B, H, W, _ = grid.shape
    A = anc.shape[0]
    anc_ = anc.reshape(1, A, 1, 1, 2)
    g = grid.reshape(B, 1, H, W, 2)
    x_tl = g[..., 0] - anc_[..., 0] / 2
    y_tl = g[..., 1] - anc_[..., 1] / 2
    x_br = g[..., 0] + anc_[..., 0] / 2
    y_br = g[..., 1] + anc_[..., 1] / 2
    coords = jnp.stack([x_tl, y_tl, x_br, y_br], axis=1)         # (B, 4, A, H, W)
    anchors_cf = coords.reshape(B, 4, A * H * W)
    anchors_last = jnp.moveaxis(coords, 1, -1).reshape(B * A * H * W, 4)
    return anchors_cf, anchors_last


def reference_on_activated_anchors(anchors_last, bboxes, iou_bna):
    """Deterministic stand-in for ReferenceOnActivatedAnchors (YOLO method).

    TODO(synk): original helper uses torch.nonzero + torch.randint (dynamic shapes,
    RNG); this deterministic substitute takes one positive anchor per GT box
    (argmax IoU) and equally many lowest-IoU anchors as negatives.
    """
    B, N, ahw = iou_bna.shape
    M = B * N
    pos_local = jnp.argmax(iou_bna, axis=2).astype(jnp.int32)    # (B, N)
    batch_off = jnp.arange(B, dtype=jnp.int32)[:, None] * ahw
    activated_anc_ind = (pos_local + batch_off).reshape(-1)      # (M,)
    GT_conf_scores = jnp.max(iou_bna, axis=2).reshape(-1)        # (M,)
    GT_class = bboxes[..., 4].reshape(-1).astype(jnp.int32)      # (M,)

    act_anc = anchors_last[activated_anc_ind]                    # (M, 4)
    gt_box = bboxes[..., :4].reshape(-1, 4)                      # (M, 4)
    xy_off = (gt_box[:, :2] + gt_box[:, 2:4] - act_anc[:, :2] - act_anc[:, 2:4]) / 2.0
    gt_wh = jnp.maximum(gt_box[:, 2:4] - gt_box[:, :2], 1e-6)    # guard padded/degenerate GT
    anc_wh = jnp.maximum(act_anc[:, 2:4] - act_anc[:, :2], 1e-6)
    wh_off = jnp.log(gt_wh / anc_wh)
    GT_offsets = jnp.concatenate([xy_off, wh_off], axis=1)       # (M, 4)

    max_iou_per_anc = jnp.max(iou_bna, axis=1).reshape(-1)       # (B*AHW,)
    negative_anc_ind = jnp.argsort(max_iou_per_anc)[:M].astype(jnp.int32)
    return activated_anc_ind, negative_anc_ind, GT_conf_scores, GT_offsets, GT_class


def single_stage_detector_forward(params, images, bboxes):
    """Training-time forward pass -> scalar total loss."""
    B = images.shape[0]
    A, C, H, W = NUM_ANCHORS, NUM_CLASSES, H_AMAP, W_AMAP
    N = bboxes.shape[1]
    M = B * N
    HW = H * W
    AHW = A * HW

    # --- backbone ---------------------------------------------------------
    # TODO(synk): FeatureExtractor (pretrained MobileNetV2) not provided; deterministic
    # substitute: 32x32 average pooling + a 3->1280 projection fused into the pred kernel.
    x = jnp.transpose(images, (0, 2, 3, 1))                       # NCHW -> NHWC
    pooled = x.reshape(B, H, 224 // H, W, 224 // W, 3).mean(axis=(2, 4))   # (B,7,7,3)

    # --- fused backbone projection + PredictionNetwork (ONE Pallas call) ----
    # TODO(synk): nn.Dropout(0.3) between the two convs treated as identity (eval mode).
    pred = prediction_network(pooled.reshape(B * HW, 3), params)  # (B*49, 128) cols>=65 zero

    # --- anchors & IoU (single-block Pallas kernel, AHW on the lane axis) ---
    grid = generate_grid(B)
    anchors_cf, anchors_last = generate_anchors(ANCHOR_LIST, grid)
    iou_bna = iou_pallas(anchors_cf, bboxes)                      # (B, N, AHW)
    anc_per_img = AHW

    pos_idx, neg_idx, _, GT_offsets, GT_class = reference_on_activated_anchors(
        anchors_last, bboxes, iou_bna)

    # --- extract per-anchor predictions directly from head rows -------------
    # (no (B,A,H,W,C) broadcast, no transpose relayout)
    def gather_anchor(idx):
        b = idx // AHW
        r = idx % AHW
        a = r // HW
        hw = r % HW
        rows = pred[b * HW + hw]                                  # (M, 128)
        cols = (5 * a)[:, None] + jnp.arange(5, dtype=idx.dtype)[None, :]
        return jnp.take_along_axis(rows, cols, axis=1), rows      # (M,5), (M,128)

    pos_data, pos_rows = gather_anchor(pos_idx)
    neg_data, _ = gather_anchor(neg_idx)
    conf_raw = jnp.concatenate([pos_data[:, 0], neg_data[:, 0]], axis=0).reshape(-1, 1)
    conf_scores = jax.nn.sigmoid(conf_raw)                        # (2M, 1)
    offsets = jnp.concatenate(
        [jax.nn.sigmoid(pos_data[:, 1:3]) - 0.5, pos_data[:, 3:5]], axis=1)   # (M, 4)
    class_scores = pos_rows[:, 5 * A: 5 * A + C]                  # (M, C)

    # --- losses: one fused Pallas reduction ----------------------------------
    gt_conf_targets = jnp.concatenate(
        [jnp.ones((M, 1), jnp.float32), jnp.zeros((M, 1), jnp.float32)], axis=0)
    onehot = jax.nn.one_hot(GT_class, C, dtype=jnp.float32)
    # TODO(synk): ObjectClassification not provided; reconstructed as
    # sum(cross_entropy) * (anc_per_img / M) / B per the A5 helper.
    total_loss = fused_loss_pallas(
        conf_scores, gt_conf_targets, offsets, GT_offsets, class_scores, onehot,
        conf_scale=1.0 / (2.0 * M),
        reg_scale=1.0 / M,
        cls_scale=(anc_per_img / M) / B,
    )
    return total_loss


# ------------------------------------------------------------------
if __name__ == "__main__":
    key = jax.random.PRNGKey(0)
    k_img, k_wf, k_w1, k_w2 = jax.random.split(key, 4)

    B, N = 2, 4
    images = jax.random.uniform(k_img, (B, 3, 224, 224), dtype=jnp.float32)
    # GT boxes (x_tl, y_tl, x_br, y_br, class) in feature-map coordinates, no padding.
    bboxes = jnp.array(
        [
            [[0.5, 0.5, 2.5, 2.5, 3.0],
             [3.0, 3.0, 5.0, 6.0, 7.0],
             [1.0, 4.0, 3.0, 6.0, 1.0],
             [4.5, 0.5, 6.5, 2.5, 12.0]],
            [[2.0, 2.0, 4.0, 4.0, 5.0],
             [0.5, 3.5, 2.5, 6.5, 9.0],
             [3.5, 0.5, 6.5, 2.5, 2.0],
             [4.0, 4.0, 6.0, 6.0, 15.0]],
        ],
        dtype=jnp.float32,
    )

    params = {
        "wf": jax.random.normal(k_wf, (3, IN_DIM), dtype=jnp.float32) * 0.1,
        "bf": jnp.zeros((IN_DIM,), jnp.float32),
        "w1": jax.random.normal(k_w1, (IN_DIM, HIDDEN_DIM), dtype=jnp.float32)
        / math.sqrt(IN_DIM),
        "b1": jnp.zeros((HIDDEN_DIM,), jnp.float32),
        "w2": jax.random.normal(k_w2, (HIDDEN_DIM, OUT_DIM), dtype=jnp.float32)
        / math.sqrt(HIDDEN_DIM),
        "b2": jnp.zeros((OUT_DIM,), jnp.float32),
    }

    total_loss = jax.jit(single_stage_detector_forward)(params, images, bboxes)
    total_loss = jax.block_until_ready(total_loss)
    assert total_loss.shape == () and bool(jnp.isfinite(total_loss))
    print("KERNEL_OK")
</pallas_src>

<mosaic_0001>
module attributes {stable_mosaic.version = 11 : i64} {
  func.func @_prednet_kernel(%arg0: memref<128x8xf32, #tpu.memory_space<vmem>>, %arg1: memref<8x1280xf32, #tpu.memory_space<vmem>>, %arg2: memref<1x1280xf32, #tpu.memory_space<vmem>>, %arg3: memref<1280x128xbf16, #tpu.memory_space<vmem>>, %arg4: memref<1x128xf32, #tpu.memory_space<vmem>>, %arg5: memref<128x128xbf16, #tpu.memory_space<vmem>>, %arg6: memref<1x128xf32, #tpu.memory_space<vmem>>, %arg7: memref<128x128xf32, #tpu.memory_space<vmem>>) attributes {dimension_semantics = [], scalar_prefetch = 0 : i64, scratch_operands = 0 : i64, tpu.core_type = #tpu.core_type<tc>} {
    %c0 = arith.constant 0 : index
    %c0_0 = arith.constant 0 : index
    %0 = vector.load %arg0[%c0, %c0_0] : memref<128x8xf32, #tpu.memory_space<vmem>>, vector<128x8xf32>
    %c0_1 = arith.constant 0 : index
    %c0_2 = arith.constant 0 : index
    %1 = vector.load %arg1[%c0_1, %c0_2] : memref<8x1280xf32, #tpu.memory_space<vmem>>, vector<8x1280xf32>
    %cst = arith.constant dense<0.000000e+00> : vector<128x1280xf32>
    %2 = tpu.matmul %0, %1, %cst {dimension_numbers = #tpu.dot_dimension_numbers<[1], [0], [0], [1], [0, 0, 1, 1], [], []>} : vector<128x8xf32>, vector<8x1280xf32>, vector<128x1280xf32> -> vector<128x1280xf32>
    %c0_3 = arith.constant 0 : index
    %c0_4 = arith.constant 0 : index
    %3 = vector.load %arg2[%c0_3, %c0_4] : memref<1x1280xf32, #tpu.memory_space<vmem>>, vector<1x1280xf32>
    %4 = vector.broadcast %3 : vector<1x1280xf32> to vector<128x1280xf32>
    %5 = arith.addf %2, %4 : vector<128x1280xf32>
    %6 = arith.truncf %5 : vector<128x1280xf32> to vector<128x1280xbf16>
    %c0_5 = arith.constant 0 : index
    %c0_6 = arith.constant 0 : index
    %7 = vector.load %arg3[%c0_5, %c0_6] : memref<1280x128xbf16, #tpu.memory_space<vmem>>, vector<1280x128xbf16>
    %cst_7 = arith.constant dense<0.000000e+00> : vector<128x128xf32>
    %8 = tpu.matmul %6, %7, %cst_7 {dimension_numbers = #tpu.dot_dimension_numbers<[1], [0], [0], [1], [0, 0, 1, 1], [], []>} : vector<128x1280xbf16>, vector<1280x128xbf16>, vector<128x128xf32> -> vector<128x128xf32>
    %c0_8 = arith.constant 0 : index
    %c0_9 = arith.constant 0 : index
    %9 = vector.load %arg4[%c0_8, %c0_9] : memref<1x128xf32, #tpu.memory_space<vmem>>, vector<1x128xf32>
    %10 = vector.broadcast %9 : vector<1x128xf32> to vector<128x128xf32>
    %11 = arith.addf %8, %10 : vector<128x128xf32>
    %cst_10 = arith.constant 0.000000e+00 : f32
    %12 = vector.broadcast %cst_10 : f32 to vector<128x128xf32>
    %13 = arith.cmpf oge, %11, %12 : vector<128x128xf32>
    %cst_11 = arith.constant 0.00999999977 : f32
    %14 = vector.broadcast %cst_11 : f32 to vector<128x128xf32>
    %15 = arith.mulf %14, %11 : vector<128x128xf32>
    %16 = arith.select %13, %11, %15 : vector<128x128xi1>, vector<128x128xf32>
    %17 = arith.truncf %16 : vector<128x128xf32> to vector<128x128xbf16>
    %c0_12 = arith.constant 0 : index
    %c0_13 = arith.constant 0 : index
    %18 = vector.load %arg5[%c0_12, %c0_13] : memref<128x128xbf16, #tpu.memory_space<vmem>>, vector<128x128xbf16>
    %cst_14 = arith.constant dense<0.000000e+00> : vector<128x128xf32>
    %19 = tpu.matmul %17, %18, %cst_14 {dimension_numbers = #tpu.dot_dimension_numbers<[1], [0], [0], [1], [0, 0, 1, 1], [], []>} : vector<128x128xbf16>, vector<128x128xbf16>, vector<128x128xf32> -> vector<128x128xf32>
    %c0_15 = arith.constant 0 : index
    %c0_16 = arith.constant 0 : index
    %20 = vector.load %arg6[%c0_15, %c0_16] : memref<1x128xf32, #tpu.memory_space<vmem>>, vector<1x128xf32>
    %21 = vector.broadcast %20 : vector<1x128xf32> to vector<128x128xf32>
    %22 = arith.addf %19, %21 : vector<128x128xf32>
    %c0_17 = arith.constant 0 : index
    %c0_18 = arith.constant 0 : index
    %23 = vector.load %arg7[%c0_17, %c0_18] : memref<128x128xf32, #tpu.memory_space<vmem>>, vector<128x128xf32>
    tpu.vector_store %arg7[%c0_17, %c0_18], %22 {strides = array<i32>} : memref<128x128xf32, #tpu.memory_space<vmem>>, vector<128x128xf32>,
    return
  }
}

module attributes {stable_mosaic.version = 11 : i64} {
  func.func @_iou_kernel(%arg0: memref<2x4x441xf32, #tpu.memory_space<vmem>>, %arg1: memref<2x4x5xf32, #tpu.memory_space<vmem>>, %arg2: memref<2x4x441xf32, #tpu.memory_space<vmem>>) attributes {dimension_semantics = [], scalar_prefetch = 0 : i64, scratch_operands = 0 : i64, tpu.core_type = #tpu.core_type<tc>} {
    %c0 = arith.constant 0 : index
    %c0_0 = arith.constant 0 : index
    %c0_1 = arith.constant 0 : index
    %0 = vector.load %arg0[%c0, %c0_0, %c0_1] : memref<2x4x441xf32, #tpu.memory_space<vmem>>, vector<2x4x441xf32>
    %c0_2 = arith.constant 0 : index
    %c0_3 = arith.constant 0 : index
    %c0_4 = arith.constant 0 : index
    %1 = vector.load %arg1[%c0_2, %c0_3, %c0_4] : memref<2x4x5xf32, #tpu.memory_space<vmem>>, vector<2x4x5xf32>
    %2 = vector.extract_strided_slice %0 {offsets = [0, 0, 0], sizes = [2, 1, 441], strides = [1, 1, 1]} : vector<2x4x441xf32> to vector<2x1x441xf32>
    %3 = vector.extract_strided_slice %0 {offsets = [0, 1, 0], sizes = [2, 1, 441], strides = [1, 1, 1]} : vector<2x4x441xf32> to vector<2x1x441xf32>
    %4 = vector.extract_strided_slice %0 {offsets = [0, 2, 0], sizes = [2, 1, 441], strides = [1, 1, 1]} : vector<2x4x441xf32> to vector<2x1x441xf32>
    %5 = vector.extract_strided_slice %0 {offsets = [0, 3, 0], sizes = [2, 1, 441], strides = [1, 1, 1]} : vector<2x4x441xf32> to vector<2x1x441xf32>
    %6 = vector.extract_strided_slice %1 {offsets = [0, 0, 0], sizes = [2, 4, 1], strides = [1, 1, 1]} : vector<2x4x5xf32> to vector<2x4x1xf32>
    %7 = vector.extract_strided_slice %1 {offsets = [0, 0, 1], sizes = [2, 4, 1], strides = [1, 1, 1]} : vector<2x4x5xf32> to vector<2x4x1xf32>
    %8 = vector.extract_strided_slice %1 {offsets = [0, 0, 2], sizes = [2, 4, 1], strides = [1, 1, 1]} : vector<2x4x5xf32> to vector<2x4x1xf32>
    %9 = vector.extract_strided_slice %1 {offsets = [0, 0, 3], sizes = [2, 4, 1], strides = [1, 1, 1]} : vector<2x4x5xf32> to vector<2x4x1xf32>
    %10 = arith.subf %4, %2 : vector<2x1x441xf32>
    %11 = arith.subf %5, %3 : vector<2x1x441xf32>
    %12 = arith.mulf %10, %11 : vector<2x1x441xf32>
    %13 = arith.subf %8, %6 : vector<2x4x1xf32>
    %14 = arith.subf %9, %7 : vector<2x4x1xf32>
    %15 = arith.mulf %13, %14 : vector<2x4x1xf32>
    %16 = vector.broadcast %2 : vector<2x1x441xf32> to vector<2x4x441xf32>
    %17 = vector.broadcast %6 : vector<2x4x1xf32> to vector<2x4x441xf32>
    %18 = arith.maximumf %16, %17 : vector<2x4x441xf32>
    %19 = vector.broadcast %4 : vector<2x1x441xf32> to vector<2x4x441xf32>
    %20 = vector.broadcast %8 : vector<2x4x1xf32> to vector<2x4x441xf32>
    %21 = arith.minimumf %19, %20 : vector<2x4x441xf32>
    %22 = vector.broadcast %3 : vector<2x1x441xf32> to vector<2x4x441xf32>
    %23 = vector.broadcast %7 : vector<2x4x1xf32> to vector<2x4x441xf32>
    %24 = arith.maximumf %22, %23 : vector<2x4x441xf32>
    %25 = vector.broadcast %5 : vector<2x1x441xf32> to vector<2x4x441xf32>
    %26 = vector.broadcast %9 : vector<2x4x1xf32> to vector<2x4x441xf32>
    %27 = arith.minimumf %25, %26 : vector<2x4x441xf32>
    %28 = arith.subf %21, %18 : vector<2x4x441xf32>
    %cst = arith.constant 0.000000e+00 : f32
    %29 = vector.broadcast %cst : f32 to vector<2x4x441xf32>
    %30 = arith.maximumf %28, %29 : vector<2x4x441xf32>
    %31 = arith.subf %27, %24 : vector<2x4x441xf32>
    %cst_5 = arith.constant 0.000000e+00 : f32
    %32 = vector.broadcast %cst_5 : f32 to vector<2x4x441xf32>
    %33 = arith.maximumf %31, %32 : vector<2x4x441xf32>
    %34 = arith.mulf %30, %33 : vector<2x4x441xf32>
    %35 = vector.broadcast %12 : vector<2x1x441xf32> to vector<2x4x441xf32>
    %36 = vector.broadcast %15 : vector<2x4x1xf32> to vector<2x4x441xf32>
    %37 = arith.addf %35, %36 : vector<2x4x441xf32>
    %38 = arith.subf %37, %34 : vector<2x4x441xf32>
    %cst_6 = arith.constant 9.99999993E-9 : f32
    %39 = vector.broadcast %cst_6 : f32 to vector<2x4x441xf32>
    %40 = arith.maximumf %38, %39 : vector<2x4x441xf32>
    %41 = arith.divf %34, %40 : vector<2x4x441xf32>
    %c0_7 = arith.constant 0 : index
    %c0_8 = arith.constant 0 : index
    %c0_9 = arith.constant 0 : index
    %42 = vector.load %arg2[%c0_7, %c0_8, %c0_9] : memref<2x4x441xf32, #tpu.memory_space<vmem>>, vector<2x4x441xf32>
    tpu.vector_store %arg2[%c0_7, %c0_8, %c0_9], %41 {strides = array<i32>} : memref<2x4x441xf32, #tpu.memory_space<vmem>>, vector<2x4x441xf32>,
    return
  }
}

module attributes {stable_mosaic.version = 11 : i64} {
  func.func @_loss_kernel(%arg0: memref<16x1xf32, #tpu.memory_space<vmem>>, %arg1: memref<16x1xf32, #tpu.memory_space<vmem>>, %arg2: memref<8x4xf32, #tpu.memory_space<vmem>>, %arg3: memref<8x4xf32, #tpu.memory_space<vmem>>, %arg4: memref<8x20xf32, #tpu.memory_space<vmem>>, %arg5: memref<8x20xf32, #tpu.memory_space<vmem>>, %arg6: memref<1x128xf32, #tpu.memory_space<vmem>>) attributes {dimension_semantics = [], scalar_prefetch = 0 : i64, scratch_operands = 0 : i64, tpu.core_type = #tpu.core_type<tc>} {
    %c0 = arith.constant 0 : index
    %c0_0 = arith.constant 0 : index
    %0 = vector.load %arg0[%c0, %c0_0] : memref<16x1xf32, #tpu.memory_space<vmem>>, vector<16x1xf32>
    %c0_1 = arith.constant 0 : index
    %c0_2 = arith.constant 0 : index
    %1 = vector.load %arg1[%c0_1, %c0_2] : memref<16x1xf32, #tpu.memory_space<vmem>>, vector<16x1xf32>
    %2 = arith.subf %0, %1 : vector<16x1xf32>
    %3 = arith.mulf %2, %2 : vector<16x1xf32>
    %4 = vector.shape_cast %3 : vector<16x1xf32> to vector<1x16x1xf32>
    %cst = arith.constant dense<0.000000e+00> : vector<1xf32>
    %5 = vector.multi_reduction <add>, %4, %cst [1, 2] : vector<1x16x1xf32> to vector<1xf32>
    %6 = vector.shape_cast %5 : vector<1xf32> to vector<1x1x1xf32>
    %7 = vector.extract %6[0, 0, 0] : f32 from vector<1x1x1xf32>
    %cst_3 = arith.constant 6.250000e-02 : f32
    %8 = arith.mulf %7, %cst_3 : f32
    %c0_4 = arith.constant 0 : index
    %c0_5 = arith.constant 0 : index
    %9 = vector.load %arg2[%c0_4, %c0_5] : memref<8x4xf32, #tpu.memory_space<vmem>>, vector<8x4xf32>
    %c0_6 = arith.constant 0 : index
    %c0_7 = arith.constant 0 : index
    %10 = vector.load %arg3[%c0_6, %c0_7] : memref<8x4xf32, #tpu.memory_space<vmem>>, vector<8x4xf32>
    %11 = arith.subf %9, %10 : vector<8x4xf32>
    %12 = arith.mulf %11, %11 : vector<8x4xf32>
    %13 = vector.shape_cast %12 : vector<8x4xf32> to vector<1x8x4xf32>
    %cst_8 = arith.constant dense<0.000000e+00> : vector<1xf32>
    %14 = vector.multi_reduction <add>, %13, %cst_8 [1, 2] : vector<1x8x4xf32> to vector<1xf32>
    %15 = vector.shape_cast %14 : vector<1xf32> to vector<1x1x1xf32>
    %16 = vector.extract %15[0, 0, 0] : f32 from vector<1x1x1xf32>
    %cst_9 = arith.constant 1.250000e-01 : f32
    %17 = arith.mulf %16, %cst_9 : f32
    %c0_10 = arith.constant 0 : index
    %c0_11 = arith.constant 0 : index
    %18 = vector.load %arg4[%c0_10, %c0_11] : memref<8x20xf32, #tpu.memory_space<vmem>>, vector<8x20xf32>
    %cst_12 = arith.constant dense<0xFF800000> : vector<8xf32>
    %19 = vector.multi_reduction <maximumf>, %18, %cst_12 [1] : vector<8x20xf32> to vector<8xf32>
    %20 = vector.shape_cast %19 : vector<8xf32> to vector<8x1xf32>
    %21 = vector.broadcast %20 : vector<8x1xf32> to vector<8x20xf32>
    %22 = arith.subf %18, %21 : vector<8x20xf32>
    %23 = math.exp %22 : vector<8x20xf32>
    %cst_13 = arith.constant dense<0.000000e+00> : vector<8xf32>
    %24 = vector.multi_reduction <add>, %23, %cst_13 [1] : vector<8x20xf32> to vector<8xf32>
    %25 = vector.shape_cast %24 : vector<8xf32> to vector<8x1xf32>
    %26 = math.log %25 : vector<8x1xf32>
    %27 = arith.addf %26, %20 : vector<8x1xf32>
    %c0_14 = arith.constant 0 : index
    %c0_15 = arith.constant 0 : index
    %28 = vector.load %arg5[%c0_14, %c0_15] : memref<8x20xf32, #tpu.memory_space<vmem>>, vector<8x20xf32>
    %29 = arith.mulf %28, %18 : vector<8x20xf32>
    %cst_16 = arith.constant dense<0.000000e+00> : vector<8xf32>
    %30 = vector.multi_reduction <add>, %29, %cst_16 [1] : vector<8x20xf32> to vector<8xf32>
    %31 = vector.shape_cast %30 : vector<8xf32> to vector<8x1xf32>
    %32 = arith.subf %27, %31 : vector<8x1xf32>
    %33 = vector.shape_cast %32 : vector<8x1xf32> to vector<1x8x1xf32>
    %cst_17 = arith.constant dense<0.000000e+00> : vector<1xf32>
    %34 = vector.multi_reduction <add>, %33, %cst_17 [1, 2] : vector<1x8x1xf32> to vector<1xf32>
    %35 = vector.shape_cast %34 : vector<1xf32> to vector<1x1x1xf32>
    %36 = vector.extract %35[0, 0, 0] : f32 from vector<1x1x1xf32>
    %cst_18 = arith.constant 2.756250e+01 : f32
    %37 = arith.mulf %36, %cst_18 : f32
    %38 = arith.addf %8, %17 : f32
    %39 = arith.addf %38, %37 : f32
    %cst_19 = arith.constant 0.000000e+00 : f32
    %40 = vector.broadcast %cst_19 : f32 to vector<1x128xf32>
    %41 = vector.broadcast %39 : f32 to vector<1x128xf32>
    %42 = arith.addf %40, %41 : vector<1x128xf32>
    %c0_20 = arith.constant 0 : index
    %c0_21 = arith.constant 0 : index
    %43 = vector.load %arg6[%c0_20, %c0_21] : memref<1x128xf32, #tpu.memory_space<vmem>>, vector<1x128xf32>
    tpu.vector_store %arg6[%c0_20, %c0_21], %42 {strides = array<i32>} : memref<1x128xf32, #tpu.memory_space<vmem>>, vector<1x128xf32>,
    return
  }
}

</mosaic_0001>

<bundles_post_ra>
// kernel: single_stage_detector_forward.4
= control target key start
LH: loop header
LB: loop body
LE: loop exit
PB: predicated region body
PF: predicated region fallthrough
CT: control target
= control target key end

     0   :  { %v653_v1 = vmov 0   ;;  %s654_s11 = smov 2   ;;  %v655_v3 = vmov 2   ;;  %v656_v4 = vmov 3   ;;  %s657_s14 = smov 127   ;;  %v658_v9 = vmov 1   ;;  %s922_s1 = inlined_call_operand.vmem [shape: f32[2,4,5], index: 1, kind: input, shape index: {}]   ;;  %s923_s0 = inlined_call_operand.vmem [shape: f32[2,4,441], index: 0, kind: input, shape index: {}]   ;;  %s924_s2 = inlined_call_operand.vmem [shape: f32[2,4,441], index: 2, kind: output, shape index: {}]  }
   0x1   :  { %v15_v0 = vld [vmem:[%s922_s1] sm:$0xf]  ;;  %629 = vset.pattern.permute.xlu1 %v653_v1  ;;  %628 = vset.pattern.permute.xlu0 %v653_v1  ;;  %v16_v2 = vld [vmem:[%s922_s1 + $0x4] sm:$0xf]  ;;  %v73_v14 = vlaneseq  ;;  %v683_v18 = vld [vmem:[%s923_s0 + $0x10] sm:$0xff]  ;;  %vm608_vm0 = vcmask 1043456  }
   0x2   :  { %55 = vrot.lane.b32.xlu0 %v15_v0, %s654_s11  ;;  %v688_v19 = vld [vmem:[%s923_s0 + $0x18] sm:$0xff]  ;;  %v693_v20 = vld [vmem:[%s923_s0] sm:$0xff]  ;;  %v706_v27 = vld [vmem:[%s923_s0 + $0x8] sm:$0xff]  ;;  %vm609_vm1 = vcmask 465924  }
   0x3   :  { %v74_v15 = vshrl.u32 %v73_v14, 7  ;;  %v21_v44 = vrot.slane %v693_v20, 6  ;;  %v22_v58 = vrot.slane %v706_v27, 6  ;;  %vm610_vm2 = vmor %vm609_vm1, %vm608_vm0 }
   0x5   :  { %v75_v16 = vsub.s32 0, %v74_v15  ;;  %v79_v17 = vsub.s32 4, %v74_v15  ;;  %v695_v21 = vsub.s32 2, %v74_v15  ;;  %v698_v23 = vsub.s32 6, %v74_v15 }
   0x6   :  { %57 = vrot.lane.b32.xlu0 %v16_v2, %s654_s11  ;;  %v251_v32 = vsub.s32 1, %v74_v15  ;;  %v255_v36 = vsub.s32 5, %v74_v15  ;;  %v29_v62 = vsub.f32 %v693_v20, %v21_v44 }
   0x7   :  { %v92_v22 = vrot.slane %v683_v18, %v75_v16  ;;  %v96_v24 = vrot.slane %v683_v18, %v79_v17  ;;  %v100_v25 = vrot.slane %v688_v19, %v75_v16  ;;  %v104_v26 = vrot.slane %v688_v19, %v79_v17 }
   0x8   :  { %v164_v28 = vrot.slane %v693_v20, %v695_v21  ;;  %v168_v29 = vrot.slane %v693_v20, %v698_v23  ;;  %v172_v31 = vrot.slane %v706_v27, %v695_v21  ;;  %v176_v37 = vrot.slane %v706_v27, %v698_v23 }
   0x9   :  { %v712_v30 = vrot.slane %v92_v22, %v75_v16  ;;  %v716_v33 = vrot.slane %v96_v24, %v75_v16  ;;  %v718_v34 = vrot.slane %v100_v25, %v75_v16  ;;  %v720_v35 = vrot.slane %v104_v26, %v75_v16 }
   0xa   :  { %146 = vperm.xlu0 %628, %v15_v0   ;;  %v725_v38 = vrot.slane %v164_v28, %v695_v21  ;;  %v728_v39 = vrot.slane %v168_v29, %v695_v21  ;;  %v252_v40 = vrot.slane %v693_v20, %v251_v32  ;;  %v76_v41 = vrot.slane %v693_v20, %v75_v16 }
   0xb   :  { %v80_v42 = vrot.slane %v693_v20, %v79_v17  ;;  %v84_v43 = vrot.slane %v706_v27, %v75_v16  ;;  %v738_v46 = vrot.slane %v172_v31, %v695_v21  ;;  %v256_v47 = vrot.slane %v693_v20, %v255_v36 }
   0xc   :  { %v260_v48 = vrot.slane %v706_v27, %v251_v32  ;;  %v88_v49 = vrot.slane %v706_v27, %v79_v17  ;;  %v264_v50 = vrot.slane %v706_v27, %v255_v36  ;;  %v268_v51 = vrot.slane %v683_v18, %v251_v32 }
   0xd   :  { %v272_v52 = vrot.slane %v683_v18, %v255_v36  ;;  %v276_v53 = vrot.slane %v688_v19, %v251_v32  ;;  %v748_v54 = vrot.slane %v176_v37, %v695_v21  ;;  %v750_v55 = vrot.slane %v252_v40, %v251_v32 }
   0xe   :  { %631 = vset.pattern.permute.xlu0 %v655_v3  ;;  %v280_v56 = vrot.slane %v688_v19, %v255_v36  ;;  %v756_v59 = vrot.slane %v76_v41, %v75_v16  ;;  %v758_v60 = vrot.slane %v80_v42, %v75_v16  ;;  %v760_v61 = vrot.slane %v84_v43, %v75_v16 }
   0xf   :  { %238 = vperm.xlu0 %631, %v16_v2   ;;  %v763_v63 = vrot.slane %v256_v47, %v251_v32  ;;  %v767_v1 = vrot.slane %v88_v49, %v75_v16  ;;  %v618_v16 = vrot.slane %v29_v62, 9  ;;  %v180_v24 = vrot.slane %v683_v18, %v695_v21 }
  0x10   :  { %v184_v25 = vrot.slane %v683_v18, %v698_v23  ;;  %v188_v26 = vrot.slane %v688_v19, %v695_v21  ;;  %v192_v28 = vrot.slane %v688_v19, %v698_v23  ;;  %v24_v37 = vrot.slane %v688_v19, 6 }
  0x11   :  { %v49_v44 = vmul.f32 %v618_v16, %v29_v62 }
  0x12   :  { %v32_v62 = vsub.f32 %v688_v19, %v24_v37 }
  0x13   :  { %633 = vset.pattern.permute.xlu0 %v656_v4 }
  0x14   :  { %410 = vperm.xlu0 %633, %v15_v0  }
  0x18   :  { %636 = vset.pattern.permute.xlu0 %v655_v3 }
  0x74   :  { %v56_v5 = vpop.permute.xlu0 %55 }
  0x75   :  { %v61_v6 = vsub.f32 %v15_v0, %v56_v5  ;;  %v773_v5 = vrot.slane %v272_v52, %v251_v32 }
  0x77   :  { %65 = vrot.lane.b32.xlu1 %v61_v6, %s657_s14 }
  0x78   :  { %v58_v7 = vpop.permute.xlu0 %57 }
  0x79   :  { %v62_v8 = vsub.f32 %v16_v2, %v58_v7 }
  0x7b   :  { %67 = vrot.lane.b32.xlu1 %v62_v8, %s657_s14 }
  0x7f   :  { %150 = vperm.xlu1 %629, %v16_v2  }
  0x83   :  { %630 = vset.pattern.permute.xlu1 %v655_v3 }
  0x84   :  { %234 = vperm.xlu1 %630, %v15_v0  }
  0x85   :  { %v753_v57 = vpop.permute.xlu0 %146 }
  0x86   :  { %v155_v14 = vmax.f32 %v760_v61, %v753_v57  ;;  %v156_v17 = vmax.f32 %v767_v1, %v753_v57 }
  0x88   :  { %632 = vset.pattern.permute.xlu1 %v658_v9  ;;  %v343_v9 = vsub.s32 7, %v74_v15 }
  0x89   :  { %322 = vperm.xlu1 %632, %v15_v0   ;;  %v765_v0 = vrot.slane %v260_v48, %v251_v32 }
  0x8a   :  { %v344_v31 = vrot.slane %v693_v20, %v343_v9  ;;  %v352_v43 = vrot.slane %v706_v27, %v343_v9  ;;  %v368_v48 = vrot.slane %v688_v19, %v343_v9 }
  0x8d   :  { %326 = vperm.xlu1 %632, %v16_v2  }
  0x91   :  { %634 = vset.pattern.permute.xlu1 %v656_v4  ;;  %v771_v4 = vrot.slane %v268_v51, %v251_v32  ;;  %v823_v51 = vrot.slane %v192_v28, %v695_v21 }
  0x92   :  { %414 = vperm.xlu1 %634, %v16_v2   ;;  %v339_v2 = vsub.s32 3, %v74_v15  ;;  %v792_v15 = vpop.permute.xlu0 %238 }
  0x94   :  { %v356_v22 = vrot.slane %v683_v18, %v339_v2  ;;  %v340_v29 = vrot.slane %v693_v20, %v339_v2  ;;  %v364_v41 = vrot.slane %v688_v19, %v339_v2  ;;  %v348_v42 = vrot.slane %v706_v27, %v339_v2 }
  0x95   :  { %v814_v20 = vrot.slane %v180_v24, %v695_v21  ;;  %v392_v16 = vrot.slane %v352_v43, %v339_v2  ;;  %v476_v24 = vrot.slane %v49_v44, %v698_v23 }
  0x96   :  { %635 = vset.pattern.permute.xlu1 %v655_v3  ;;  %v769_v3 = vrot.slane %v264_v50, %v251_v32  ;;  %v811_v49 = vrot.slane %v356_v22, %v339_v2  ;;  %v817_v50 = vrot.slane %v184_v25, %v695_v21  ;;  %v380_v52 = vrot.slane %v340_v29, %v339_v2 }
  0x97   :  { %v472_v22 = vrot.slane %v49_v44, %v695_v21  ;;  %v830_v25 = vrot.slane %v364_v41, %v339_v2  ;;  %v245_v28 = vmin.f32 %v814_v20, %v792_v15  ;;  %v621_v41 = vrot.slane %v32_v62, 9 }
  0x98   :  { %v246_v29 = vmin.f32 %v817_v50, %v792_v15  ;;  %v850_v20 = vrot.slane %v476_v24, %v695_v21 }
  0xe9   :  { %v66_v10 = vpop.permute.xlu1 %65 }
  0xea   :  { %v71_v11 = vmul.f32 %v66_v10, %v61_v6  ;;  %v775_v6 = vrot.slane %v276_v53, %v251_v32  ;;  %v30_v10 = vsub.f32 %v706_v27, %v22_v58  ;;  %v384_v27 = vrot.slane %v344_v31, %v339_v2 }
  0xec   :  { %543 = vperm.xlu1 %635, %v71_v11   ;;  %v23_v11 = vrot.slane %v683_v18, 6  ;;  %v619_v36 = vrot.slane %v30_v10, 9 }
  0xed   :  { %v68_v12 = vpop.permute.xlu1 %67 }
  0xee   :  { %v72_v13 = vmul.f32 %v68_v12, %v62_v8  ;;  %v779_v8 = vrot.slane %v280_v56, %v251_v32  ;;  %v153_v12 = vmax.f32 %v756_v59, %v753_v57  ;;  %v360_v32 = vrot.slane %v683_v18, %v343_v9  ;;  %v411_v56 = vpop.permute.xlu0 %410 }
  0xef   :  { %v31_v40 = vsub.f32 %v683_v18, %v23_v11  ;;  %v820_v18 = vrot.slane %v188_v26, %v695_v21  ;;  %v50_v58 = vmul.f32 %v619_v36, %v30_v10  ;;  %v388_v11 = vrot.slane %v348_v42, %v339_v2 }
  0xf0   :  { %548 = vperm.xlu0 %636, %v72_v13   ;;  %v154_v13 = vmax.f32 %v758_v60, %v753_v57  ;;  %v825_v53 = vrot.slane %v360_v32, %v339_v2  ;;  %v832_v26 = vrot.slane %v368_v48, %v339_v2  ;;  %v248_v10 = vmin.f32 %v823_v51, %v792_v15 }
  0xf1   :  { %v620_v9 = vrot.slane %v31_v40, 9  ;;  %v247_v19 = vmin.f32 %v820_v18, %v792_v15  ;;  %v417_v31 = vmin.f32 %v380_v52, %v411_v56  ;;  %v418_v32 = vmin.f32 %v384_v27, %v411_v56 }
  0xf2   :  { %v480_v37 = vrot.slane %v50_v58, %v695_v21  ;;  %v484_v2 = vrot.slane %v50_v58, %v698_v23  ;;  %v419_v43 = vmin.f32 %v388_v11, %v411_v56  ;;  %v420_v44 = vmin.f32 %v392_v16, %v411_v56 }
  0xf3   :  { %v844_v42 = vmul.f32 %v620_v9, %v31_v40  ;;  %v847_v48 = vrot.slane %v472_v22, %v695_v21  ;;  %v866_v9 = vmul.f32 %v621_v41, %v32_v62 }
  0xf4   :  { %v520_v58 = vrot.slane %v480_v37, %v695_v21 }
  0xfa   :  { %v735_v45 = vpop.permute.xlu1 %150 }
  0xff   :  { %v777_v7 = vpop.permute.xlu1 %234 }
 0x100   :  { %v241_v15 = vmin.f32 %v725_v38, %v777_v7  ;;  %v242_v50 = vmin.f32 %v728_v39, %v777_v7  ;;  %v243_v18 = vmin.f32 %v738_v46, %v777_v7  ;;  %v244_v40 = vmin.f32 %v748_v54, %v777_v7 }
 0x101   :  { %v524_v38 = vrot.slane %v484_v2, %v695_v21  ;;  %v488_v39 = vrot.slane %v844_v42, %v695_v21  ;;  %v157_v46 = vmax.f32 %v712_v30, %v735_v45  ;;  %v158_v54 = vmax.f32 %v716_v33, %v735_v45 }
 0x102   :  { %v427_v30 = vsub.f32 %v243_v18, %v155_v14  ;;  %v428_v33 = vsub.f32 %v244_v40, %v156_v17 }
 0x103   :  { %v429_v17 = vsub.f32 %v245_v28, %v157_v46  ;;  %v430_v62 = vsub.f32 %v246_v29, %v158_v54  ;;  %v500_v28 = vrot.slane %v866_v9, %v698_v23  ;;  %v528_v29 = vrot.slane %v488_v39, %v695_v21 }
 0x104   :  { %v323_v47 = vpop.permute.xlu1 %322  ;;  %v435_v24 = vmax.f32 %v427_v30, 0.0 }
 0x105   :  { %v329_v51 = vmax.f32 %v750_v55, %v323_v47  ;;  %v330_v52 = vmax.f32 %v763_v63, %v323_v47  ;;  %v331_v27 = vmax.f32 %v765_v0, %v323_v47  ;;  %v332_v56 = vmax.f32 %v769_v3, %v323_v47 }
 0x106   :  { %v159_v55 = vmax.f32 %v718_v34, %v735_v45  ;;  %v160_v63 = vmax.f32 %v720_v35, %v735_v45  ;;  %v425_v0 = vsub.f32 %v241_v15, %v153_v12  ;;  %v426_v3 = vsub.f32 %v242_v50, %v154_v13 }
 0x107   :  { %v441_v7 = vsub.f32 %v417_v31, %v329_v51  ;;  %v442_v47 = vsub.f32 %v418_v32, %v330_v52  ;;  %v443_v35 = vsub.f32 %v419_v43, %v331_v27  ;;  %v444_v45 = vsub.f32 %v420_v44, %v332_v56 }
 0x108   :  { %v327_v36 = vpop.permute.xlu1 %326  ;;  %v431_v11 = vsub.f32 %v247_v19, %v159_v55  ;;  %v432_v16 = vsub.f32 %v248_v10, %v160_v63  ;;  %v433_v22 = vmax.f32 %v425_v0, 0.0  ;;  %v437_v19 = vmax.f32 %v429_v17, 0.0 }
 0x109   :  { %v333_v59 = vmax.f32 %v771_v4, %v327_v36  ;;  %v334_v12 = vmax.f32 %v773_v5, %v327_v36  ;;  %v335_v60 = vmax.f32 %v775_v6, %v327_v36  ;;  %v336_v13 = vmax.f32 %v779_v8, %v327_v36 }
 0x10a   :  { %v434_v4 = vmax.f32 %v426_v3, 0.0  ;;  %v436_v5 = vmax.f32 %v428_v33, 0.0  ;;  %v449_v31 = vmax.f32 %v441_v7, 0.0  ;;  %v450_v6 = vmax.f32 %v442_v47, 0.0 }
 0x10b   :  { %v451_v32 = vmax.f32 %v443_v35, 0.0  ;;  %v452_v8 = vmax.f32 %v444_v45, 0.0  ;;  %v438_v10 = vmax.f32 %v430_v62, 0.0  ;;  %v439_v2 = vmax.f32 %v431_v11, 0.0 }
 0x10c   :  { %v440_v41 = vmax.f32 %v432_v16, 0.0  ;;  %v457_v43 = vmul.f32 %v449_v31, %v433_v22  ;;  %v458_v44 = vmul.f32 %v450_v6, %v434_v4  ;;  %v540_v54 = vrot.slane %v500_v28, %v695_v21 }
 0x10d   :  { %v415_v34 = vpop.permute.xlu1 %414  ;;  %v459_v15 = vmul.f32 %v451_v32, %v435_v24  ;;  %v460_v50 = vmul.f32 %v452_v8, %v436_v5 }
 0x10e   :  { %v421_v61 = vmin.f32 %v811_v49, %v415_v34  ;;  %v422_v14 = vmin.f32 %v825_v53, %v415_v34  ;;  %v423_v57 = vmin.f32 %v830_v25, %v415_v34  ;;  %v424_v1 = vmin.f32 %v832_v26, %v415_v34 }
 0x10f   :  { %v492_v25 = vrot.slane %v844_v42, %v698_v23  ;;  %v496_v26 = vrot.slane %v866_v9, %v695_v21 }
 0x110   :  { %v445_v36 = vsub.f32 %v421_v61, %v333_v59  ;;  %v446_v49 = vsub.f32 %v422_v14, %v334_v12  ;;  %v447_v37 = vsub.f32 %v423_v57, %v335_v60  ;;  %v448_v53 = vsub.f32 %v424_v1, %v336_v13 }
 0x111   :  { %v532_v39 = vrot.slane %v492_v25, %v695_v21  ;;  %v536_v46 = vrot.slane %v496_v26, %v695_v21 }
 0x112   :  { %v453_v18 = vmax.f32 %v445_v36, 0.0  ;;  %v454_v40 = vmax.f32 %v446_v49, 0.0  ;;  %v455_v51 = vmax.f32 %v447_v37, 0.0  ;;  %v456_v42 = vmax.f32 %v448_v53, 0.0 }
 0x114   :  { %v461_v33 = vmul.f32 %v453_v18, %v437_v19  ;;  %v462_v34 = vmul.f32 %v454_v40, %v438_v10  ;;  %v463_v7 = vmul.f32 %v455_v51, %v439_v2  ;;  %v464_v47 = vmul.f32 %v456_v42, %v440_v41 }
 0x167   :  { %v544_v52 = vpop.permute.xlu1 %543 }
 0x168   :  { %v551_v27 = vadd.f32 %v544_v52, %v847_v48  ;;  %v552_v56 = vadd.f32 %v544_v52, %v850_v20  ;;  %v553_v23 = vadd.f32 %v544_v52, %v520_v58  ;;  %v554_v9 = vadd.f32 %v544_v52, %v524_v38 }
 0x16a   :  { %v559_v55 = vsub.f32 %v551_v27, %v457_v43  ;;  %v560_v63 = vsub.f32 %v552_v56, %v458_v44  ;;  %v561_v0 = vsub.f32 %v553_v23, %v459_v15  ;;  %v562_v3 = vsub.f32 %v554_v9, %v460_v50 }
 0x16b   :  { %v549_v30 = vpop.permute.xlu0 %548 }
 0x16c   :  { %v567_v48 = vmax.f32 %v559_v55, 1e-08  ;;  %v568_v35 = vmax.f32 %v560_v63, 1e-08  ;;  %v569_v20 = vmax.f32 %v561_v0, 1e-08  ;;  %v555_v58 = vadd.f32 %v549_v30, %v528_v29 }
 0x16d   :  { %v570_v38 = vmax.f32 %v562_v3, 1e-08  ;;  %v556_v45 = vadd.f32 %v549_v30, %v532_v39  ;;  %v557_v59 = vadd.f32 %v549_v30, %v536_v46  ;;  %v558_v12 = vadd.f32 %v549_v30, %v540_v54 }
 0x16e   :  { %637 = vrcp.f32 %v567_v48  ;;  %v563_v60 = vsub.f32 %v555_v58, %v461_v33 }
 0x16f   :  { %639 = vrcp.f32 %v568_v35  ;;  %v564_v21 = vsub.f32 %v556_v45, %v462_v34  ;;  %v565_v13 = vsub.f32 %v557_v59, %v463_v7  ;;  %v566_v61 = vsub.f32 %v558_v12, %v464_v47 }
 0x170   :  { %641 = vrcp.f32 %v569_v20  ;;  %v571_v14 = vmax.f32 %v563_v60, 1e-08 }
 0x171   :  { %643 = vrcp.f32 %v570_v38  ;;  %v572_v57 = vmax.f32 %v564_v21, 1e-08  ;;  %v573_v1 = vmax.f32 %v565_v13, 1e-08  ;;  %v574_v17 = vmax.f32 %v566_v61, 1e-08 }
 0x172   :  { %645 = vrcp.f32 %v571_v14 }
 0x173   :  { %647 = vrcp.f32 %v572_v57 }
 0x174   :  { %649 = vrcp.f32 %v573_v1 }
 0x175   :  { %651 = vrcp.f32 %v574_v17 }
 0x17b   :  { %v638_v62 = vpop.eup %637 }
 0x17c   :  { %v640_v11 = vpop.eup %639  ;;  %v576_v16 = vmul.f32 %v638_v62, %v457_v43 }
 0x17d   :  { %v642_v22 = vpop.eup %641  ;;  %v578_v4 = vmul.f32 %v640_v11, %v458_v44 }
 0x17e   :  { %v644_v24 = vpop.eup %643  ;;  %v580_v5 = vmul.f32 %v642_v22, %v459_v15 }
 0x17f   :  { %v646_v31 = vpop.eup %645  ;;  %v582_v6 = vmul.f32 %v644_v24, %v460_v50  ;;  %v599_v32 = vcombine.low %v576_v16, %v578_v4 }
 0x180   :  { %v648_v8 = vpop.eup %647  ;;  %v584_v36 = vmul.f32 %v646_v31, %v461_v33 }
 0x181   :  { %v650_v49 = vpop.eup %649  ;;  %v600_v37 = vcombine.low %v580_v5, %v582_v6  ;;  %607 = vst [vmem:[%s924_s2] sm:$0xff] %v599_v32  ;;  %v586_v53 = vmul.f32 %v648_v8, %v462_v34 }
 0x182   :  { %v652_v25 = vpop.eup %651  ;;  %v588_v26 = vmul.f32 %v650_v49, %v463_v7 }
 0x183   :  { %611 = vst.msk [vmem:[%s924_s2 + $0x8] sm:$0xff] %vm610_vm2, %v600_v37  ;;  %v590_v28 = vmul.f32 %v652_v25, %v464_v47  ;;  %v601_v29 = vcombine.low %v584_v36, %v586_v53 }
 0x185   :  { %v602_v19 = vcombine.low %v588_v26, %v590_v28  ;;  %612 = vst [vmem:[%s924_s2 + $0x10] sm:$0xff] %v601_v29 }
 0x187   :  { %613 = vst.msk [vmem:[%s924_s2 + $0x18] sm:$0xff] %vm610_vm2, %v602_v19 }

// kernel: single_stage_detector_forward.3
= control target key start
LH: loop header
LB: loop body
LE: loop exit
PB: predicated region body
PF: predicated region fallthrough
CT: control target
= control target key end

     0   :  { %v3046_v2 = vmov 0.0   ;;  %vm107_vm0 = vcmask 64512   ;;  %v57_v61 = vlaneseq  ;;  %s4275_s1 = inlined_call_operand.vmem [shape: f32[8,1280], index: 1, kind: input, shape index: {}]   ;;  %s4276_s0 = inlined_call_operand.vmem [shape: f32[128,8], index: 0, kind: input, shape index: {}]   ;;  %s4277_s3 = inlined_call_operand.vmem [shape: bf16[1280,128], index: 3, kind: input, shape index: {}]   ;;  %s4278_s2 = inlined_call_operand.vmem [shape: f32[1,1280], index: 2, kind: input, shape index: {}]   ;;  %s4279_s5 = inlined_call_operand.vmem [shape: bf16[128,128], index: 5, kind: input, shape index: {}]   ;;  %s4280_s4 = inlined_call_operand.vmem [shape: f32[1,128], index: 4, kind: input, shape index: {}]   ;;  %s4281_s6 = inlined_call_operand.vmem [shape: f32[1,128], index: 6, kind: input, shape index: {}]   ;;  %s4282_s7 = inlined_call_operand.vmem [shape: f32[128,128], index: 7, kind: output, shape index: {}]  }
   0x1   :  { %v44_v0 = vld [vmem:[%s4275_s1 + $0x8] sm:$0xff]  ;;  %v43_v1 = vld [vmem:[%s4275_s1] sm:$0xff]  ;;  %220 = vmatprep.mubr.f32.mxu0 %v3046_v2  ;;  %292 = vmatprep.mubr.f32.mxu1 %v3046_v2  ;;  %v46_v6 = vld [vmem:[%s4275_s1 + $0x18] sm:$0xff] }
   0x2   :  { %v3098_v3 = vld [vmem:[%s4276_s0] sm:$0xff]  ;;  %186 = vmatprep.subr.mxu0 %v44_v0  ;;  %2955 = vmatprep.subr.mxu1 %v44_v0  ;;  %v3112_v5 = vld [vmem:[%s4276_s0 + $0x8] sm:$0xff]  ;;  %v45_v7 = vld [vmem:[%s4275_s1 + $0x10] sm:$0xff]  ;;  %v3539_v62 = vshrl.u32 %v57_v61, 7 }
   0x3   :  { %v3103_v4 = vld [vmem:[%s4276_s0 + $0x60] sm:$0xff]  ;;  %187 = vmatpush1.msra.mxu0 %v43_v1  ;;  %2956 = vmatpush1.msra.mxu1 %v43_v1  ;;  %v3125_v8 = vld [vmem:[%s4276_s0 + $0x68] sm:$0xff]  ;;  %v50_v11 = vld [vmem:[%s4275_s1 + $0x38] sm:$0xff] }
   0x4   :  { %2417 = vmatmul.mubr.msk.f32.vlgmr.msra.gmra.mxu0 %vm107_vm0, %v3098_v3  ;;  %2429 = vmatmul.mubr.msk.f32.vlgmr.msra.gmra.mxu1 %vm107_vm0, %v3103_v4  ;;  %v48_v9 = vld [vmem:[%s4275_s1 + $0x28] sm:$0xff]  ;;  %v47_v10 = vld [vmem:[%s4275_s1 + $0x20] sm:$0xff]  ;;  %v3145_v12 = vld [vmem:[%s4276_s0 + $0x10] sm:$0xff]  ;;  %v63_v63 = vsub.s32 1, %v3539_v62  ;;  %v59_v0 = vsub.s32 0, %v3539_v62 }
   0x5   :  { %226 = vmatprep.mubr.f32.mxu0 %v3046_v2  ;;  %298 = vmatprep.mubr.f32.mxu1 %v3046_v2  ;;  %v3150_v13 = vld [vmem:[%s4276_s0 + $0x70] sm:$0xff]  ;;  %v52_v14 = vld [vmem:[%s4275_s1 + $0x48] sm:$0xff]  ;;  %v3164_v15 = vld [vmem:[%s4276_s0 + $0x18] sm:$0xff] }
   0x6   :  { %347 = vmatprep.subr.mxu1 %v46_v6  ;;  %508 = vmatprep.subr.mxu0 %v48_v9  ;;  %v3169_v16 = vld [vmem:[%s4276_s0 + $0x78] sm:$0xff]  ;;  %v3178_v17 = vld [vmem:[%s4276_s0 + $0x20] sm:$0xff]  ;;  %v49_v18 = vld [vmem:[%s4275_s1 + $0x30] sm:$0xff] }
   0x7   :  { %348 = vmatpush1.msra.mxu1 %v45_v7  ;;  %509 = vmatpush1.msra.mxu0 %v47_v10  ;;  %v2958_v19 = vld [vmem:[%s4277_s3 + $0x78] sm:$0xff]   ;;  %v3195_v20 = vld [vmem:[%s4276_s0 + $0x28] sm:$0xff]  ;;  %v3202_v21 = vld [vmem:[%s4276_s0 + $0x30] sm:$0xff] }
   0x8   :  { %2418 = vmatmul.mubr.msk.f32.gmra.mxu0 %vm107_vm0, %v3112_v5  ;;  %2430 = vmatmul.mubr.msk.f32.gmra.mxu1 %vm107_vm0, %v3125_v8  ;;  %v3217_v22 = vld [vmem:[%s4276_s0 + $0x38] sm:$0xff]  ;;  %v3224_v23 = vld [vmem:[%s4276_s0 + $0x40] sm:$0xff]  ;;  %v3239_v24 = vld [vmem:[%s4276_s0 + $0x48] sm:$0xff] }
   0x9   :  { %232 = vmatprep.mubr.f32.mxu0 %v3046_v2  ;;  %304 = vmatprep.mubr.f32.mxu1 %v3046_v2  ;;  %v3246_v25 = vld [vmem:[%s4276_s0 + $0x50] sm:$0xff]  ;;  %v3261_v26 = vld [vmem:[%s4276_s0 + $0x58] sm:$0xff]  ;;  %v51_v27 = vld [vmem:[%s4275_s1 + $0x40] sm:$0xff] }
   0xa   :  { %669 = vmatprep.subr.mxu1 %v50_v11  ;;  %830 = vmatprep.subr.mxu0 %v52_v14  ;;  %v2972_v28 = vld [vmem:[%s4277_s3 + $0xf8] sm:$0xff]   ;;  %v2960_v30 = vld [vmem:[%s4277_s3 + $0x70] sm:$0xff]   ;;  %v2962_v32 = vld [vmem:[%s4277_s3 + $0x68] sm:$0xff]  }
   0xb   :  { %v2959_v29 = vld [vmem:[%s4277_s3 + $0x38] sm:$0xff]   ;;  %v2961_v31 = vld [vmem:[%s4277_s3 + $0x30] sm:$0xff]   ;;  %v2963_v33 = vld [vmem:[%s4277_s3 + $0x28] sm:$0xff]  }
   0xc   :  { %2419 = vmatmul.mubr.msk.f32.gmra.mxu0 %vm107_vm0, %v3145_v12  ;;  %2431 = vmatmul.mubr.msk.f32.gmra.mxu1 %vm107_vm0, %v3150_v13  ;;  %v2964_v34 = vld [vmem:[%s4277_s3 + $0x60] sm:$0xff]   ;;  %v2966_v36 = vld [vmem:[%s4277_s3 + $0x58] sm:$0xff]   ;;  %v2968_v38 = vld [vmem:[%s4277_s3 + $0x50] sm:$0xff]  }
   0xd   :  { %238 = vmatprep.mubr.f32.mxu0 %v3046_v2  ;;  %310 = vmatprep.mubr.f32.mxu1 %v3046_v2  ;;  %v2965_v35 = vld [vmem:[%s4277_s3 + $0x20] sm:$0xff]   ;;  %v2967_v37 = vld [vmem:[%s4277_s3 + $0x18] sm:$0xff]   ;;  %v2969_v39 = vld [vmem:[%s4277_s3 + $0x10] sm:$0xff]  }
   0xe   :  { %v2970_v40 = vld [vmem:[%s4277_s3 + $0x48] sm:$0xff]   ;;  %v2976_v42 = vld [vmem:[%s4277_s3 + $0x40] sm:$0xff]   ;;  %v2982_v44 = vld [vmem:[%s4277_s3 + $0x178] sm:$0xff]  }
   0xf   :  { %v2971_v41 = vld [vmem:[%s4277_s3 + $0x8] sm:$0xff]   ;;  %v2977_v43 = vld [vmem:[%s4277_s3] sm:$0xff]   ;;  %v2973_v45 = vld [vmem:[%s4277_s3 + $0xb8] sm:$0xff]  }
  0x10   :  { %2420 = vmatmul.mubr.msk.f32.gmra.mxu0 %vm107_vm0, %v3164_v15  ;;  %2432 = vmatmul.mubr.msk.f32.gmra.mxu1 %vm107_vm0, %v3169_v16  ;;  %v2974_v46 = vld [vmem:[%s4277_s3 + $0xf0] sm:$0xff]   ;;  %v2978_v48 = vld [vmem:[%s4277_s3 + $0xe8] sm:$0xff]   ;;  %v2980_v50 = vld [vmem:[%s4277_s3 + $0xe0] sm:$0xff]  }
  0x11   :  { %244 = vmatprep.mubr.f32.mxu0 %v3046_v2  ;;  %381 = vmatprep.mubr.f32.mxu1 %v3046_v2  ;;  %v2975_v47 = vld [vmem:[%s4277_s3 + $0xb0] sm:$0xff]   ;;  %v2979_v49 = vld [vmem:[%s4277_s3 + $0xa8] sm:$0xff]   ;;  %v2981_v51 = vld [vmem:[%s4277_s3 + $0xa0] sm:$0xff]  }
  0x12   :  { %v2983_v52 = vld [vmem:[%s4277_s3 + $0xd8] sm:$0xff]   ;;  %v2986_v54 = vld [vmem:[%s4277_s3 + $0xd0] sm:$0xff]   ;;  %v2989_v56 = vld [vmem:[%s4277_s3 + $0xc8] sm:$0xff]  }
  0x13   :  { %v2985_v53 = vld [vmem:[%s4277_s3 + $0x98] sm:$0xff]   ;;  %v2987_v55 = vld [vmem:[%s4277_s3 + $0x90] sm:$0xff]   ;;  %v2991_v57 = vld [vmem:[%s4277_s3 + $0x88] sm:$0xff]  }
  0x14   :  { %2421 = vmatmul.mubr.msk.f32.gmra.mxu0 %vm107_vm0, %v3178_v17  ;;  %2433 = vmatmul.mubr.msk.f32.vlgmr.msra.gmra.mxu1 %vm107_vm0, %v3098_v3  ;;  %v2992_v58 = vld [vmem:[%s4277_s3 + $0xc0] sm:$0xff]   ;;  %v3004_v60 = vld [vmem:[%s4277_s3 + $0x1f8] sm:$0xff]  }
  0x15   :  { %250 = vmatprep.mubr.f32.mxu0 %v3046_v2  ;;  %387 = vmatprep.mubr.f32.mxu1 %v3046_v2  ;;  %v2993_v59 = vld [vmem:[%s4277_s3 + $0x80] sm:$0xff]  }
  0x16   :  { %670 = vmatpush1.msra.mxu1 %v49_v18 }
  0x17   :  { %2587 = vmatprep.subr.bf16.mxu1 %v2958_v19  ;;  %v2984_v19 = vld [vmem:[%s4277_s3 + $0x138] sm:$0xff]  }
  0x18   :  { %2422 = vmatmul.mubr.msk.f32.gmra.mxu0 %vm107_vm0, %v3195_v20  ;;  %2434 = vmatmul.mubr.msk.f32.gmra.mxu1 %vm107_vm0, %v3112_v5 }
  0x19   :  { %256 = vmatprep.mubr.f32.mxu0 %v3046_v2  ;;  %393 = vmatprep.mubr.f32.mxu1 %v3046_v2 }
  0x1c   :  { %2423 = vmatmul.mubr.msk.f32.gmra.mxu0 %vm107_vm0, %v3202_v21  ;;  %2435 = vmatmul.mubr.msk.f32.gmra.mxu1 %vm107_vm0, %v3145_v12 }
  0x1d   :  { %262 = vmatprep.mubr.f32.mxu0 %v3046_v2  ;;  %399 = vmatprep.mubr.f32.mxu1 %v3046_v2 }
  0x20   :  { %2424 = vmatmul.mubr.msk.f32.gmra.mxu0 %vm107_vm0, %v3217_v22  ;;  %2436 = vmatmul.mubr.msk.f32.gmra.mxu1 %vm107_vm0, %v3164_v15 }
  0x21   :  { %268 = vmatprep.mubr.f32.mxu0 %v3046_v2  ;;  %405 = vmatprep.mubr.f32.mxu1 %v3046_v2 }
  0x24   :  { %2425 = vmatmul.mubr.msk.f32.gmra.mxu0 %vm107_vm0, %v3224_v23  ;;  %2437 = vmatmul.mubr.msk.f32.gmra.mxu1 %vm107_vm0, %v3178_v17 }
  0x25   :  { %274 = vmatprep.mubr.f32.mxu0 %v3046_v2  ;;  %411 = vmatprep.mubr.f32.mxu1 %v3046_v2 }
  0x28   :  { %2426 = vmatmul.mubr.msk.f32.gmra.mxu0 %vm107_vm0, %v3239_v24  ;;  %2438 = vmatmul.mubr.msk.f32.gmra.mxu1 %vm107_vm0, %v3195_v20 }
  0x29   :  { %280 = vmatprep.mubr.f32.mxu0 %v3046_v2  ;;  %417 = vmatprep.mubr.f32.mxu1 %v3046_v2 }
  0x2c   :  { %2427 = vmatmul.mubr.msk.f32.gmra.mxu0 %vm107_vm0, %v3246_v25  ;;  %2439 = vmatmul.mubr.msk.f32.gmra.mxu1 %vm107_vm0, %v3202_v21 }
  0x2d   :  { %286 = vmatprep.mubr.f32.mxu0 %v3046_v2  ;;  %423 = vmatprep.mubr.f32.mxu1 %v3046_v2 }
  0x30   :  { %2428 = vmatmul.mubr.msk.f32.gmra.mxu0 %vm107_vm0, %v3261_v26  ;;  %2440 = vmatmul.mubr.msk.f32.gmra.mxu1 %vm107_vm0, %v3217_v22 }
  0x31   :  { %429 = vmatprep.mubr.f32.mxu1 %v3046_v2  ;;  %542 = vmatprep.mubr.f32.mxu0 %v3046_v2 }
  0x34   :  { %2441 = vmatmul.mubr.msk.f32.gmra.mxu1 %vm107_vm0, %v3224_v23  ;;  %2449 = vmatmul.mubr.msk.f32.vlgmr.msra.gmra.mxu0 %vm107_vm0, %v3098_v3 }
  0x35   :  { %435 = vmatprep.mubr.f32.mxu1 %v3046_v2  ;;  %548 = vmatprep.mubr.f32.mxu0 %v3046_v2 }
  0x36   :  { %831 = vmatpush1.msra.mxu0 %v51_v27  ;;  %v71_v27 = vsub.s32 3, %v3539_v62 }
  0x37   :  { %2651 = vmatprep.subr.bf16.mxu0 %v2972_v28  ;;  %v2990_v28 = vld [vmem:[%s4277_s3 + $0x130] sm:$0xff]  }
  0x38   :  { %2442 = vmatmul.mubr.msk.f32.gmra.mxu1 %vm107_vm0, %v3239_v24  ;;  %2450 = vmatmul.mubr.msk.f32.gmra.mxu0 %vm107_vm0, %v3112_v5 }
  0x39   :  { %441 = vmatprep.mubr.f32.mxu1 %v3046_v2  ;;  %554 = vmatprep.mubr.f32.mxu0 %v3046_v2 }
  0x3c   :  { %2443 = vmatmul.mubr.msk.f32.gmra.mxu1 %vm107_vm0, %v3246_v25  ;;  %2451 = vmatmul.mubr.msk.f32.gmra.mxu0 %vm107_vm0, %v3145_v12 }
  0x3d   :  { %447 = vmatprep.mubr.f32.mxu1 %v3046_v2  ;;  %560 = vmatprep.mubr.f32.mxu0 %v3046_v2 }
  0x40   :  { %2444 = vmatmul.mubr.msk.f32.gmra.mxu1 %vm107_vm0, %v3261_v26  ;;  %2452 = vmatmul.mubr.msk.f32.gmra.mxu0 %vm107_vm0, %v3164_v15 }
  0x41   :  { %453 = vmatprep.mubr.f32.mxu1 %v3046_v2  ;;  %566 = vmatprep.mubr.f32.mxu0 %v3046_v2 }
  0x44   :  { %2445 = vmatmul.mubr.msk.f32.gmra.mxu1 %vm107_vm0, %v3103_v4  ;;  %2453 = vmatmul.mubr.msk.f32.gmra.mxu0 %vm107_vm0, %v3178_v17 }
  0x45   :  { %459 = vmatprep.mubr.f32.mxu1 %v3046_v2  ;;  %572 = vmatprep.mubr.f32.mxu0 %v3046_v2 }
  0x48   :  { %2446 = vmatmul.mubr.msk.f32.gmra.mxu1 %vm107_vm0, %v3125_v8  ;;  %2454 = vmatmul.mubr.msk.f32.gmra.mxu0 %vm107_vm0, %v3195_v20 }
  0x49   :  { %465 = vmatprep.mubr.f32.mxu1 %v3046_v2  ;;  %578 = vmatprep.mubr.f32.mxu0 %v3046_v2 }
  0x4c   :  { %2447 = vmatmul.mubr.msk.f32.gmra.mxu1 %vm107_vm0, %v3150_v13  ;;  %2455 = vmatmul.mubr.msk.f32.gmra.mxu0 %vm107_vm0, %v3202_v21 }
  0x4d   :  { %471 = vmatprep.mubr.f32.mxu1 %v3046_v2  ;;  %584 = vmatprep.mubr.f32.mxu0 %v3046_v2 }
  0x50   :  { %2448 = vmatmul.mubr.msk.f32.gmra.mxu1 %vm107_vm0, %v3169_v16  ;;  %2456 = vmatmul.mubr.msk.f32.gmra.mxu0 %vm107_vm0, %v3217_v22 }
  0x51   :  { %703 = vmatprep.mubr.f32.mxu1 %v3046_v2  ;;  %590 = vmatprep.mubr.f32.mxu0 %v3046_v2 }
  0x54   :  { %2465 = vmatmul.mubr.msk.f32.vlgmr.msra.gmra.mxu1 %vm107_vm0, %v3098_v3  ;;  %2457 = vmatmul.mubr.msk.f32.gmra.mxu0 %vm107_vm0, %v3224_v23 }
  0x55   :  { %709 = vmatprep.mubr.f32.mxu1 %v3046_v2  ;;  %596 = vmatprep.mubr.f32.mxu0 %v3046_v2 }
  0x56   :  { %2588 = vmatpush3.bf16.msra.mxu1 %v2959_v29 }
  0x57   :  { %2589 = vmatprep.subr.bf16.mxu1 %v2960_v30 }
  0x58   :  { %2466 = vmatmul.mubr.msk.f32.gmra.mxu1 %vm107_vm0, %v3112_v5  ;;  %2458 = vmatmul.mubr.msk.f32.gmra.mxu0 %vm107_vm0, %v3239_v24 }
  0x59   :  { %715 = vmatprep.mubr.f32.mxu1 %v3046_v2  ;;  %602 = vmatprep.mubr.f32.mxu0 %v3046_v2 }
  0x5a   :  { %2590 = vmatpush3.bf16.msra.mxu1 %v2961_v31 }
  0x5b   :  { %2591 = vmatprep.subr.bf16.mxu1 %v2962_v32  ;;  %v2994_v32 = vld [vmem:[%s4277_s3 + $0x168] sm:$0xff]  }
  0x5c   :  { %2467 = vmatmul.mubr.msk.f32.gmra.mxu1 %vm107_vm0, %v3145_v12  ;;  %2459 = vmatmul.mubr.msk.f32.gmra.mxu0 %vm107_vm0, %v3246_v25 }
  0x5d   :  { %721 = vmatprep.mubr.f32.mxu1 %v3046_v2  ;;  %608 = vmatprep.mubr.f32.mxu0 %v3046_v2 }
  0x5e   :  { %2592 = vmatpush3.bf16.msra.mxu1 %v2963_v33 }
  0x5f   :  { %2593 = vmatprep.subr.bf16.mxu1 %v2964_v34 }
  0x60   :  { %2468 = vmatmul.mubr.msk.f32.gmra.mxu1 %vm107_vm0, %v3164_v15  ;;  %2460 = vmatmul.mubr.msk.f32.gmra.mxu0 %vm107_vm0, %v3261_v26 }
  0x61   :  { %727 = vmatprep.mubr.f32.mxu1 %v3046_v2  ;;  %614 = vmatprep.mubr.f32.mxu0 %v3046_v2 }
  0x62   :  { %2594 = vmatpush3.bf16.msra.mxu1 %v2965_v35 }
  0x63   :  { %2595 = vmatprep.subr.bf16.mxu1 %v2966_v36 }
  0x64   :  { %2469 = vmatmul.mubr.msk.f32.gmra.mxu1 %vm107_vm0, %v3178_v17  ;;  %2461 = vmatmul.mubr.msk.f32.gmra.mxu0 %vm107_vm0, %v3103_v4 }
  0x65   :  { %733 = vmatprep.mubr.f32.mxu1 %v3046_v2  ;;  %620 = vmatprep.mubr.f32.mxu0 %v3046_v2 }
  0x66   :  { %2596 = vmatpush3.bf16.msra.mxu1 %v2967_v37 }
  0x67   :  { %2597 = vmatprep.subr.bf16.mxu1 %v2968_v38 }
  0x68   :  { %2470 = vmatmul.mubr.msk.f32.gmra.mxu1 %vm107_vm0, %v3195_v20  ;;  %2462 = vmatmul.mubr.msk.f32.gmra.mxu0 %vm107_vm0, %v3125_v8 }
  0x69   :  { %739 = vmatprep.mubr.f32.mxu1 %v3046_v2  ;;  %626 = vmatprep.mubr.f32.mxu0 %v3046_v2 }
  0x6a   :  { %2598 = vmatpush3.bf16.msra.mxu1 %v2969_v39 }
  0x6b   :  { %2599 = vmatprep.subr.bf16.mxu1 %v2970_v40 }
  0x6c   :  { %2471 = vmatmul.mubr.msk.f32.gmra.mxu1 %vm107_vm0, %v3202_v21  ;;  %2463 = vmatmul.mubr.msk.f32.gmra.mxu0 %vm107_vm0, %v3150_v13 }
  0x6d   :  { %745 = vmatprep.mubr.f32.mxu1 %v3046_v2  ;;  %632 = vmatprep.mubr.f32.mxu0 %v3046_v2 }
  0x6e   :  { %2600 = vmatpush3.bf16.msra.mxu1 %v2971_v41  ;;  %v2995_v41 = vld [vmem:[%s4277_s3 + $0x128] sm:$0xff]  }
  0x6f   :  { %2601 = vmatprep.subr.bf16.mxu1 %v2976_v42 }
  0x70   :  { %2472 = vmatmul.mubr.msk.f32.gmra.mxu1 %vm107_vm0, %v3217_v22  ;;  %2464 = vmatmul.mubr.msk.f32.gmra.mxu0 %vm107_vm0, %v3169_v16 }
  0x71   :  { %751 = vmatprep.mubr.f32.mxu1 %v3046_v2  ;;  %864 = vmatprep.mubr.f32.mxu0 %v3046_v2 }
  0x72   :  { %2602 = vmatpush3.bf16.msra.mxu1 %v2977_v43 }
  0x73   :  { %2715 = vmatprep.subr.bf16.mxu1 %v2982_v44 }
  0x74   :  { %2473 = vmatmul.mubr.msk.f32.gmra.mxu1 %vm107_vm0, %v3224_v23  ;;  %2481 = vmatmul.mubr.msk.f32.vlgmr.msra.gmra.mxu0 %vm107_vm0, %v3098_v3 }
  0x75   :  { %757 = vmatprep.mubr.f32.mxu1 %v3046_v2  ;;  %870 = vmatprep.mubr.f32.mxu0 %v3046_v2 }
  0x76   :  { %2652 = vmatpush3.bf16.msra.mxu0 %v2973_v45  ;;  %v2996_v45 = vld [vmem:[%s4277_s3 + $0x160] sm:$0xff]  }
  0x77   :  { %2653 = vmatprep.subr.bf16.mxu0 %v2974_v46 }
  0x78   :  { %2474 = vmatmul.mubr.msk.f32.gmra.mxu1 %vm107_vm0, %v3239_v24  ;;  %2482 = vmatmul.mubr.msk.f32.gmra.mxu0 %vm107_vm0, %v3112_v5 }
  0x79   :  { %763 = vmatprep.mubr.f32.mxu1 %v3046_v2  ;;  %876 = vmatprep.mubr.f32.mxu0 %v3046_v2 }
  0x7a   :  { %2654 = vmatpush3.bf16.msra.mxu0 %v2975_v47 }
  0x7b   :  { %2655 = vmatprep.subr.bf16.mxu0 %v2978_v48 }
  0x7c   :  { %2475 = vmatmul.mubr.msk.f32.gmra.mxu1 %vm107_vm0, %v3246_v25  ;;  %2483 = vmatmul.mubr.msk.f32.gmra.mxu0 %vm107_vm0, %v3145_v12 }
  0x7d   :  { %769 = vmatprep.mubr.f32.mxu1 %v3046_v2  ;;  %882 = vmatprep.mubr.f32.mxu0 %v3046_v2 }
  0x7e   :  { %2656 = vmatpush3.bf16.msra.mxu0 %v2979_v49 }
  0x7f   :  { %2657 = vmatprep.subr.bf16.mxu0 %v2980_v50 }
  0x80   :  { %2476 = vmatmul.mubr.msk.f32.gmra.mxu1 %vm107_vm0, %v3261_v26  ;;  %2484 = vmatmul.mubr.msk.f32.gmra.mxu0 %vm107_vm0, %v3164_v15 }
  0x81   :  { %775 = vmatprep.mubr.f32.mxu1 %v3046_v2  ;;  %888 = vmatprep.mubr.f32.mxu0 %v3046_v2 }
  0x82   :  { %2658 = vmatpush3.bf16.msra.mxu0 %v2981_v51  ;;  %v2997_v51 = vld [vmem:[%s4277_s3 + $0x120] sm:$0xff]  }
  0x83   :  { %2659 = vmatprep.subr.bf16.mxu0 %v2983_v52 }
  0x84   :  { %2477 = vmatmul.mubr.msk.f32.gmra.mxu1 %vm107_vm0, %v3103_v4  ;;  %2485 = vmatmul.mubr.msk.f32.gmra.mxu0 %vm107_vm0, %v3178_v17 }
  0x85   :  { %781 = vmatprep.mubr.f32.mxu1 %v3046_v2  ;;  %894 = vmatprep.mubr.f32.mxu0 %v3046_v2 }
  0x86   :  { %2660 = vmatpush3.bf16.msra.mxu0 %v2985_v53 }
  0x87   :  { %2661 = vmatprep.subr.bf16.mxu0 %v2986_v54 }
  0x88   :  { %2478 = vmatmul.mubr.msk.f32.gmra.mxu1 %vm107_vm0, %v3125_v8  ;;  %2486 = vmatmul.mubr.msk.f32.gmra.mxu0 %vm107_vm0, %v3195_v20 }
  0x89   :  { %787 = vmatprep.mubr.f32.mxu1 %v3046_v2  ;;  %900 = vmatprep.mubr.f32.mxu0 %v3046_v2 }
  0x8a   :  { %2662 = vmatpush3.bf16.msra.mxu0 %v2987_v55  ;;  %v2998_v55 = vld [vmem:[%s4277_s3 + $0x158] sm:$0xff]  }
  0x8b   :  { %2663 = vmatprep.subr.bf16.mxu0 %v2989_v56 }
  0x8c   :  { %2479 = vmatmul.mubr.msk.f32.gmra.mxu1 %vm107_vm0, %v3150_v13  ;;  %2487 = vmatmul.mubr.msk.f32.gmra.mxu0 %vm107_vm0, %v3202_v21 }
  0x8d   :  { %793 = vmatprep.mubr.f32.mxu1 %v3046_v2  ;;  %906 = vmatprep.mubr.f32.mxu0 %v3046_v2 }
  0x8e   :  { %2664 = vmatpush3.bf16.msra.mxu0 %v2991_v57 }
  0x8f   :  { %2665 = vmatprep.subr.bf16.mxu0 %v2992_v58 }
  0x90   :  { %2480 = vmatmul.mubr.msk.f32.gmra.mxu1 %vm107_vm0, %v3169_v16  ;;  %2488 = vmatmul.mubr.msk.f32.gmra.mxu0 %vm107_vm0, %v3217_v22 }
  0x91   :  { %912 = vmatprep.mubr.f32.mxu0 %v3046_v2 }
  0x92   :  { %2666 = vmatpush3.bf16.msra.mxu0 %v2993_v59 }
  0x93   :  { %2779 = vmatprep.subr.bf16.mxu0 %v3004_v60 }
  0x94   :  { %2489 = vmatmul.mubr.msk.f32.gmra.mxu0 %vm107_vm0, %v3224_v23  ;;  %v2988_v23 = vld [vmem:[%s4277_s3 + $0x170] sm:$0xff]  }
  0x95   :  { %918 = vmatprep.mubr.f32.mxu0 %v3046_v2 }
  0x98   :  { %2490 = vmatmul.mubr.msk.f32.gmra.mxu0 %vm107_vm0, %v3239_v24 }
  0x99   :  { %924 = vmatprep.mubr.f32.mxu0 %v3046_v2 }
  0x9c   :  { %2491 = vmatmul.mubr.msk.f32.gmra.mxu0 %vm107_vm0, %v3246_v25 }
  0x9d   :  { %930 = vmatprep.mubr.f32.mxu0 %v3046_v2 }
  0xa0   :  { %2492 = vmatmul.mubr.msk.f32.gmra.mxu0 %vm107_vm0, %v3261_v26  ;;  %v67_v26 = vsub.s32 2, %v3539_v62 }
  0xa1   :  { %936 = vmatprep.mubr.f32.mxu0 %v3046_v2 }
  0xa4   :  { %2493 = vmatmul.mubr.msk.f32.gmra.mxu0 %vm107_vm0, %v3103_v4  ;;  %v3548_v4 = vld [vmem:[%s4278_s2] sm:$0xff] }
  0xa5   :  { %942 = vmatprep.mubr.f32.mxu0 %v3046_v2  ;;  %v3555_v6 = vrot.slane %v3548_v4, %v63_v63  ;;  %v3560_v7 = vrot.slane %v3548_v4, %v59_v0  ;;  %v3597_v37 = vrot.slane %v3548_v4, %v67_v26  ;;  %v3600_v40 = vrot.slane %v3548_v4, %v71_v27  ;;  %v3001_v26 = vld [vmem:[%s4277_s3 + $0x110] sm:$0xff]  }
  0xa8   :  { %2494 = vmatmul.mubr.msk.f32.gmra.mxu0 %vm107_vm0, %v3125_v8 }
  0xa9   :  { %948 = vmatprep.mubr.f32.mxu0 %v3046_v2 }
  0xac   :  { %2495 = vmatmul.mubr.msk.f32.gmra.mxu0 %vm107_vm0, %v3150_v13 }
  0xad   :  { %954 = vmatprep.mubr.f32.mxu0 %v3046_v2 }
  0xb0   :  { %2496 = vmatmul.mubr.msk.f32.gmra.mxu0 %vm107_vm0, %v3169_v16 }
  0xc4   :  { %v222_v1 = vpop.f32.mrf.mxu0  ;;  %v3543_v3 = vpop.f32.mrf.mxu1 }
  0xc5   :  { %v223_v15 = vadd.f32 %v222_v1, %v3560_v7 }
  0xc6   :  { %v224_v5 = vpop.f32.mrf.mxu0  ;;  %v3550_v2 = vpop.f32.mrf.mxu1 }
  0xc7   :  { %v225_v13 = vadd.f32 %v224_v5, %v3555_v6 }
  0xc8   :  { %v228_v8 = vpop.f32.mrf.mxu0  ;;  %v3562_v9 = vpop.f32.mrf.mxu1 }
  0xc9   :  { %v229_v10 = vadd.f32 %v228_v8, %v3560_v7 }
  0xca   :  { %v230_v11 = vpop.f32.mrf.mxu0  ;;  %v3565_v12 = vpop.f32.mrf.mxu1 }
  0xcb   :  { %v231_v14 = vadd.f32 %v230_v11, %v3555_v6  ;;  %v961_v20 = vpack.c.bf16 %v229_v10, %v223_v15  ;;  %v2999_v10 = vld [vmem:[%s4277_s3 + $0x118] sm:$0xff]  }
  0xcc   :  { %v234_v16 = vpop.f32.mrf.mxu0  ;;  %v3570_v17 = vpop.f32.mrf.mxu1  ;;  %v3005_v11 = vld [vmem:[%s4277_s3 + $0x1b8] sm:$0xff]  }
  0xcd   :  { %v962_v18 = vpack.c.bf16 %v231_v14, %v225_v13  ;;  %v235_v35 = vadd.f32 %v234_v16, %v3560_v7  ;;  %v3000_v16 = vld [vmem:[%s4277_s3 + $0x150] sm:$0xff]  }
  0xce   :  { %v236_v21 = vpop.f32.mrf.mxu0  ;;  %v3575_v22 = vpop.f32.mrf.mxu1 }
  0xcf   :  { %1720 = vmatprep.mubr.bf16.mxu1 %v962_v18  ;;  %v237_v33 = vadd.f32 %v236_v21, %v3555_v6  ;;  %v3006_v18 = vld [vmem:[%s4277_s3 + $0x1f0] sm:$0xff]  }
  0xd0   :  { %v240_v24 = vpop.f32.mrf.mxu0  ;;  %v3580_v25 = vpop.f32.mrf.mxu1  ;;  %1721 = vmatmul.mubr.bf16.vlgmr.msra.gmra.mxu1 %v961_v20 }
  0xd1   :  { %2716 = vmatpush3.bf16.msra.mxu1 %v2984_v19  ;;  %v241_v29 = vadd.f32 %v240_v24, %v3560_v7 }
  0xd2   :  { %v242_v30 = vpop.f32.mrf.mxu0  ;;  %v3588_v31 = vpop.f32.mrf.mxu1  ;;  %2717 = vmatprep.subr.bf16.mxu1 %v2988_v23 }
  0xd3   :  { %v243_v34 = vadd.f32 %v242_v30, %v3555_v6  ;;  %v971_v42 = vpack.c.bf16 %v241_v29, %v235_v35  ;;  %v3002_v30 = vld [vmem:[%s4277_s3 + $0x148] sm:$0xff]  }
  0xd4   :  { %v246_v36 = vpop.f32.mrf.mxu0  ;;  %v383_v38 = vpop.f32.mrf.mxu1 }
  0xd5   :  { %v972_v39 = vpack.c.bf16 %v243_v34, %v237_v33  ;;  %2718 = vmatpush3.bf16.msra.mxu1 %v2990_v28  ;;  %v384_v46 = vadd.f32 %v383_v38, %v3597_v37  ;;  %v247_v59 = vadd.f32 %v246_v36, %v3560_v7 }
  0xd6   :  { %v248_v43 = vpop.f32.mrf.mxu0  ;;  %v385_v44 = vpop.f32.mrf.mxu1  ;;  %2719 = vmatprep.subr.bf16.mxu1 %v2994_v32  ;;  %v3007_v32 = vld [vmem:[%s4277_s3 + $0x1b0] sm:$0xff]  }
  0xd7   :  { %1728 = vmatprep.mubr.bf16.mxu1 %v972_v39  ;;  %v386_v49 = vadd.f32 %v385_v44, %v3600_v40  ;;  %v249_v56 = vadd.f32 %v248_v43, %v3555_v6  ;;  %v3003_v44 = vld [vmem:[%s4277_s3 + $0x108] sm:$0xff]  }
  0xd8   :  { %v252_v47 = vpop.f32.mrf.mxu0  ;;  %v389_v48 = vpop.f32.mrf.mxu1  ;;  %1729 = vmatmul.mubr.bf16.gmra.mxu1 %v971_v42 }
  0xd9   :  { %v390_v50 = vadd.f32 %v389_v48, %v3597_v37  ;;  %2720 = vmatpush3.bf16.msra.mxu1 %v2995_v41  ;;  %v253_v52 = vadd.f32 %v252_v47, %v3560_v7 }
  0xda   :  { %v254_v53 = vpop.f32.mrf.mxu0  ;;  %v391_v54 = vpop.f32.mrf.mxu1  ;;  %2721 = vmatprep.subr.bf16.mxu1 %v2996_v45  ;;  %v3010_v45 = vld [vmem:[%s4277_s3 + $0x1e8] sm:$0xff]  }
  0xdb   :  { %v255_v57 = vadd.f32 %v254_v53, %v3555_v6  ;;  %v392_v58 = vadd.f32 %v391_v54, %v3600_v40  ;;  %v963_v60 = vpack.c.bf16 %v390_v50, %v384_v46  ;;  %v981_v13 = vpack.c.bf16 %v253_v52, %v247_v59  ;;  %v3011_v50 = vld [vmem:[%s4277_s3 + $0x1a8] sm:$0xff]  }
  0xdc   :  { %v258_v61 = vpop.f32.mrf.mxu0  ;;  %v395_v1 = vpop.f32.mrf.mxu1 }
  0xdd   :  { %v982_v5 = vpack.c.bf16 %v255_v57, %v249_v56  ;;  %v964_v8 = vpack.c.bf16 %v392_v58, %v386_v49  ;;  %2722 = vmatpush3.bf16.msra.mxu1 %v2997_v51  ;;  %v396_v19 = vadd.f32 %v395_v1, %v3597_v37  ;;  %v259_v36 = vadd.f32 %v258_v61, %v3560_v7  ;;  %v3008_v49 = vld [vmem:[%s4277_s3 + $0x140] sm:$0xff]   ;;  %v3014_v1 = vld [vmem:[%s4277_s3 + $0x278] sm:$0xff]  }
  0xde   :  { %v260_v14 = vpop.f32.mrf.mxu0  ;;  %v397_v15 = vpop.f32.mrf.mxu1  ;;  %2723 = vmatprep.subr.bf16.mxu1 %v2998_v55  ;;  %v3012_v51 = vld [vmem:[%s4277_s3 + $0x1e0] sm:$0xff]  }
  0xdf   :  { %1736 = vmatprep.mubr.bf16.mxu1 %v982_v5  ;;  %1817 = vmatprep.mubr.bf16.mxu0 %v964_v8  ;;  %v398_v23 = vadd.f32 %v397_v15, %v3600_v40  ;;  %v261_v33 = vadd.f32 %v260_v14, %v3555_v6  ;;  %v3009_v57 = vld [vmem:[%s4277_s3 + $0x100] sm:$0xff]  }
  0xe0   :  { %v264_v20 = vpop.f32.mrf.mxu0  ;;  %v401_v21 = vpop.f32.mrf.mxu1  ;;  %1737 = vmatmul.mubr.bf16.gmra.mxu1 %v981_v13  ;;  %1818 = vmatmul.mubr.bf16.vlgmr.msra.gmra.mxu0 %v963_v60  ;;  %v3013_v61 = vld [vmem:[%s4277_s3 + $0x1a0] sm:$0xff]  }
  0xe1   :  { %v402_v24 = vadd.f32 %v401_v21, %v3597_v37  ;;  %2724 = vmatpush3.bf16.msra.mxu1 %v2999_v10  ;;  %2780 = vmatpush3.bf16.msra.mxu0 %v3005_v11  ;;  %v265_v27 = vadd.f32 %v264_v20, %v3560_v7 }
  0xe2   :  { %v266_v28 = vpop.f32.mrf.mxu0  ;;  %v403_v29 = vpop.f32.mrf.mxu1  ;;  %2725 = vmatprep.subr.bf16.mxu1 %v3000_v16  ;;  %2781 = vmatprep.subr.bf16.mxu0 %v3006_v18 }
  0xe3   :  { %v267_v34 = vadd.f32 %v266_v28, %v3555_v6  ;;  %v404_v35 = vadd.f32 %v403_v29, %v3600_v40  ;;  %v973_v38 = vpack.c.bf16 %v402_v24, %v396_v19  ;;  %v991_v46 = vpack.c.bf16 %v265_v27, %v259_v36  ;;  %v3015_v19 = vld [vmem:[%s4277_s3 + $0x1d8] sm:$0xff]  }
  0xe4   :  { %v270_v39 = vpop.f32.mrf.mxu0  ;;  %v407_v41 = vpop.f32.mrf.mxu1  ;;  %v3017_v24 = vld [vmem:[%s4277_s3 + $0x198] sm:$0xff]  }
  0xe5   :  { %v992_v42 = vpack.c.bf16 %v267_v34, %v261_v33  ;;  %v974_v43 = vpack.c.bf16 %v404_v35, %v398_v23  ;;  %2726 = vmatpush3.bf16.msra.mxu1 %v3001_v26  ;;  %2782 = vmatpush3.bf16.msra.mxu0 %v3007_v32  ;;  %v408_v52 = vadd.f32 %v407_v41, %v3597_v37  ;;  %v3018_v26 = vld [vmem:[%s4277_s3 + $0x1d0] sm:$0xff]  }
  0xe6   :  { %v272_v47 = vpop.f32.mrf.mxu0  ;;  %v409_v48 = vpop.f32.mrf.mxu1  ;;  %2727 = vmatprep.subr.bf16.mxu1 %v3002_v30  ;;  %2783 = vmatprep.subr.bf16.mxu0 %v3010_v45  ;;  %v271_v11 = vadd.f32 %v270_v39, %v3560_v7  ;;  %v297_v33 = vadd.f32 %v3550_v2, %v3555_v6  ;;  %v303_v39 = vadd.f32 %v3565_v12, %v3555_v6 }
  0xe7   :  { %1744 = vmatprep.mubr.bf16.mxu1 %v992_v42  ;;  %1825 = vmatprep.mubr.bf16.mxu0 %v974_v43  ;;  %v410_v55 = vadd.f32 %v409_v48, %v3600_v40  ;;  %v273_v5 = vadd.f32 %v272_v47, %v3555_v6 }
  0xe8   :  { %v276_v53 = vpop.f32.mrf.mxu0  ;;  %v413_v54 = vpop.f32.mrf.mxu1  ;;  %1745 = vmatmul.mubr.bf16.gmra.mxu1 %v991_v46  ;;  %1826 = vmatmul.mubr.bf16.gmra.mxu0 %v973_v38  ;;  %v3019_v38 = vld [vmem:[%s4277_s3 + $0x190] sm:$0xff]  }
  0xe9   :  { %v414_v56 = vadd.f32 %v413_v54, %v3597_v37  ;;  %2728 = vmatpush3.bf16.msra.mxu1 %v3003_v44  ;;  %v277_v58 = vadd.f32 %v276_v53, %v3560_v7  ;;  %2784 = vmatpush3.bf16.msra.mxu0 %v3011_v50  ;;  %v1022_v53 = vpack.c.bf16 %v303_v39, %v297_v33  ;;  %v3024_v54 = vld [vmem:[%s4277_s3 + $0x1c0] sm:$0xff]  }
  0xea   :  { %v278_v59 = vpop.f32.mrf.mxu0  ;;  %v415_v60 = vpop.f32.mrf.mxu1  ;;  %2729 = vmatprep.subr.bf16.mxu1 %v3008_v49  ;;  %2785 = vmatprep.subr.bf16.mxu0 %v3012_v51  ;;  %v3021_v49 = vld [vmem:[%s4277_s3 + $0x1c8] sm:$0xff]  }
  0xeb   :  { %v279_v8 = vadd.f32 %v278_v59, %v3555_v6  ;;  %v416_v10 = vadd.f32 %v415_v60, %v3600_v40  ;;  %v983_v13 = vpack.c.bf16 %v414_v56, %v408_v52  ;;  %v1001_v20 = vpack.c.bf16 %v277_v58, %v271_v11  ;;  %v3023_v52 = vld [vmem:[%s4277_s3 + $0x188] sm:$0xff]  }
  0xec   :  { %v282_v14 = vpop.f32.mrf.mxu0  ;;  %v419_v15 = vpop.f32.mrf.mxu1  ;;  %v79_v60 = vsub.s32 5, %v3539_v62  ;;  %v309_v11 = vadd.f32 %v3575_v22, %v3555_v6 }
  0xed   :  { %v1002_v16 = vpack.c.bf16 %v279_v8, %v273_v5  ;;  %v984_v18 = vpack.c.bf16 %v416_v10, %v410_v55  ;;  %2730 = vmatpush3.bf16.msra.mxu1 %v3009_v57  ;;  %2786 = vmatpush3.bf16.msra.mxu0 %v3013_v61  ;;  %v420_v27 = vadd.f32 %v419_v15, %v3597_v37  ;;  %v3025_v10 = vld [vmem:[%s4277_s3 + $0x180] sm:$0xff]  }
  0xee   :  { %v284_v21 = vpop.f32.mrf.mxu0  ;;  %v421_v23 = vpop.f32.mrf.mxu1  ;;  %2843 = vmatprep.subr.bf16.mxu1 %v3014_v1  ;;  %2787 = vmatprep.subr.bf16.mxu0 %v3015_v19  ;;  %v283_v2 = vadd.f32 %v282_v14, %v3560_v7  ;;  %v295_v61 = vadd.f32 %v3543_v3, %v3560_v7  ;;  %v301_v1 = vadd.f32 %v3562_v9, %v3560_v7 }
  0xef   :  { %1752 = vmatprep.mubr.bf16.mxu1 %v1002_v16  ;;  %1833 = vmatprep.mubr.bf16.mxu0 %v984_v18  ;;  %v422_v30 = vadd.f32 %v421_v23, %v3600_v40  ;;  %v285_v41 = vadd.f32 %v284_v21, %v3555_v6  ;;  %v3739_v18 = vrot.slane %v3548_v4, %v79_v60 }
  0xf0   :  { %v288_v28 = vpop.f32.mrf.mxu0  ;;  %v425_v29 = vpop.f32.mrf.mxu1  ;;  %1753 = vmatmul.mubr.bf16.gmra.mxu1 %v1001_v20  ;;  %1834 = vmatmul.mubr.bf16.gmra.mxu0 %v983_v13  ;;  %v315_v13 = vadd.f32 %v3588_v31, %v3555_v6  ;;  %v1021_v19 = vpack.c.bf16 %v301_v1, %v295_v61  ;;  %v3016_v61 = vld [vmem:[%s4277_s3 + $0x238] sm:$0xff]  }
  0xf1   :  { %v426_v32 = vadd.f32 %v425_v29, %v3597_v37  ;;  %v289_v34 = vadd.f32 %v288_v28, %v3560_v7  ;;  %2788 = vmatpush3.bf16.msra.mxu0 %v3017_v24  ;;  %v307_v29 = vadd.f32 %v3570_v17, %v3560_v7 }
  0xf2   :  { %v290_v35 = vpop.f32.mrf.mxu0  ;;  %v427_v36 = vpop.f32.mrf.mxu1  ;;  %2789 = vmatprep.subr.bf16.mxu0 %v3018_v26  ;;  %v1032_v23 = vpack.c.bf16 %v315_v13, %v309_v11  ;;  %v83_v13 = vsub.s32 6, %v3539_v62 }
  0xf3   :  { %v291_v42 = vadd.f32 %v290_v35, %v3555_v6  ;;  %v428_v43 = vadd.f32 %v427_v36, %v3600_v40  ;;  %v993_v44 = vpack.c.bf16 %v426_v32, %v420_v27  ;;  %v1011_v12 = vpack.c.bf16 %v289_v34, %v283_v2 }
  0xf4   :  { %v431_v45 = vpop.f32.mrf.mxu1  ;;  %v3707_v46 = vpop.f32.mrf.mxu0  ;;  %v75_v32 = vsub.s32 4, %v3539_v62 }
  0xf5   :  { %v1012_v47 = vpack.c.bf16 %v291_v42, %v285_v41  ;;  %v994_v48 = vpack.c.bf16 %v428_v43, %v422_v30  ;;  %2790 = vmatpush3.bf16.msra.mxu0 %v3019_v38  ;;  %v432_v55 = vadd.f32 %v431_v45, %v3597_v37  ;;  %v313_v30 = vadd.f32 %v3580_v25, %v3560_v7 }
  0xf6   :  { %v433_v50 = vpop.f32.mrf.mxu1  ;;  %v546_v51 = vpop.f32.mrf.mxu0  ;;  %2791 = vmatprep.subr.bf16.mxu0 %v3021_v49  ;;  %v3757_v2 = vrot.slane %v3548_v4, %v75_v32  ;;  %v3027_v32 = vld [vmem:[%s4277_s3 + $0x228] sm:$0xff]  }
  0xf7   :  { %1760 = vmatprep.mubr.bf16.mxu1 %v1012_v47  ;;  %1841 = vmatprep.mubr.bf16.mxu0 %v994_v48  ;;  %v434_v58 = vadd.f32 %v433_v50, %v3600_v40  ;;  %v547_v27 = vadd.f32 %v546_v51, %v3739_v18  ;;  %v1031_v43 = vpack.c.bf16 %v313_v30, %v307_v29 }
  0xf8   :  { %v437_v56 = vpop.f32.mrf.mxu1  ;;  %1761 = vmatmul.mubr.bf16.gmra.mxu1 %v1011_v12  ;;  %1842 = vmatmul.mubr.bf16.gmra.mxu0 %v993_v44  ;;  %v3719_v57 = vpop.f32.mrf.mxu0  ;;  %v545_v50 = vadd.f32 %v3707_v46, %v3757_v2  ;;  %v3020_v46 = vld [vmem:[%s4277_s3 + $0x270] sm:$0xff]  }
  0xf9   :  { %v438_v59 = vadd.f32 %v437_v56, %v3597_v37  ;;  %1768 = vmatprep.mubr.bf16.mxu1 %v1022_v53  ;;  %2792 = vmatpush3.bf16.msra.mxu0 %v3023_v52  ;;  %v551_v51 = vadd.f32 %v3719_v57, %v3757_v2 }
  0xfa   :  { %v439_v5 = vpop.f32.mrf.mxu1  ;;  %v552_v8 = vpop.f32.mrf.mxu0  ;;  %2793 = vmatprep.subr.bf16.mxu0 %v3024_v54 }
  0xfb   :  { %v440_v14 = vadd.f32 %v439_v5, %v3600_v40  ;;  %v1003_v3 = vpack.c.bf16 %v438_v59, %v432_v55  ;;  %v553_v28 = vadd.f32 %v552_v8, %v3739_v18  ;;  %v965_v1 = vpack.c.bf16 %v551_v51, %v545_v50 }
  0xfc   :  { %v443_v15 = vpop.f32.mrf.mxu1  ;;  %v3736_v16 = vpop.f32.mrf.mxu0 }
  0xfd   :  { %v1004_v9 = vpack.c.bf16 %v440_v14, %v434_v58  ;;  %2794 = vmatpush3.bf16.msra.mxu0 %v3025_v10  ;;  %v444_v22 = vadd.f32 %v443_v15, %v3597_v37  ;;  %v966_v42 = vpack.c.bf16 %v553_v28, %v547_v27  ;;  %v3800_v27 = vrot.slane %v3548_v4, %v83_v13 }
  0xfe   :  { %v445_v20 = vpop.f32.mrf.mxu1  ;;  %v558_v21 = vpop.f32.mrf.mxu0 }
  0xff   :  { %1849 = vmatprep.mubr.bf16.mxu0 %v1004_v9  ;;  %v446_v24 = vadd.f32 %v445_v20, %v3600_v40  ;;  %v559_v49 = vadd.f32 %v558_v21, %v3739_v18  ;;  %v3022_v20 = vld [vmem:[%s4277_s3 + $0x230] sm:$0xff]   ;;  %v557_v21 = vadd.f32 %v3736_v16, %v3757_v2 }
 0x100   :  { %v449_v6 = vpop.f32.mrf.mxu1  ;;  %1769 = vmatmul.mubr.bf16.gmra.mxu1 %v1021_v19  ;;  %1850 = vmatmul.mubr.bf16.gmra.mxu0 %v1003_v3  ;;  %v3742_v31 = vpop.f32.mrf.mxu0  ;;  %v87_v19 = vsub.s32 7, %v3539_v62 }
 0x101   :  { %v450_v26 = vadd.f32 %v449_v6, %v3597_v37  ;;  %1776 = vmatprep.mubr.bf16.mxu1 %v1032_v23  ;;  %v563_v23 = vadd.f32 %v3742_v31, %v3757_v2 }
 0x102   :  { %v451_v33 = vpop.f32.mrf.mxu1  ;;  %v564_v34 = vpop.f32.mrf.mxu0  ;;  %v3805_v31 = vrot.slane %v3548_v4, %v87_v19 }
 0x103   :  { %v452_v35 = vadd.f32 %v451_v33, %v3600_v40  ;;  %v1013_v36 = vpack.c.bf16 %v450_v26, %v444_v22  ;;  %v565_v12 = vadd.f32 %v564_v34, %v3739_v18  ;;  %v975_v33 = vpack.c.bf16 %v563_v23, %v557_v21 }
 0x104   :  { %v455_v38 = vpop.f32.mrf.mxu1  ;;  %v3754_v39 = vpop.f32.mrf.mxu0 }
 0x105   :  { %v1014_v41 = vpack.c.bf16 %v452_v35, %v446_v24  ;;  %v456_v7 = vadd.f32 %v455_v38, %v3597_v37  ;;  %v976_v60 = vpack.c.bf16 %v565_v12, %v559_v49  ;;  %v3028_v35 = vld [vmem:[%s4277_s3 + $0x260] sm:$0xff]   ;;  %v3030_v49 = vld [vmem:[%s4277_s3 + $0x258] sm:$0xff]  }
 0x106   :  { %v457_v17 = vpop.f32.mrf.mxu1  ;;  %v570_v44 = vpop.f32.mrf.mxu0 }
 0x107   :  { %1857 = vmatprep.mubr.bf16.mxu0 %v1014_v41  ;;  %v458_v47 = vadd.f32 %v457_v17, %v3600_v40  ;;  %v571_v11 = vadd.f32 %v570_v44, %v3739_v18  ;;  %v3029_v44 = vld [vmem:[%s4277_s3 + $0x220] sm:$0xff]  }
 0x108   :  { %v461_v25 = vpop.f32.mrf.mxu1  ;;  %1777 = vmatmul.mubr.bf16.gmra.mxu1 %v1031_v43  ;;  %1858 = vmatmul.mubr.bf16.gmra.mxu0 %v1013_v36  ;;  %v3760_v45 = vpop.f32.mrf.mxu0 }
 0x109   :  { %v462_v48 = vadd.f32 %v461_v25, %v3597_v37  ;;  %1914 = vmatprep.mubr.bf16.mxu1 %v966_v42  ;;  %v575_v25 = vadd.f32 %v3760_v45, %v3757_v2 }
 0x10a   :  { %v463_v52 = vpop.f32.mrf.mxu1  ;;  %v576_v53 = vpop.f32.mrf.mxu0 }
 0x10b   :  { %v464_v54 = vadd.f32 %v463_v52, %v3600_v40  ;;  %v1023_v55 = vpack.c.bf16 %v462_v48, %v456_v7  ;;  %v577_v9 = vadd.f32 %v576_v53, %v3739_v18  ;;  %v569_v7 = vadd.f32 %v3754_v39, %v3757_v2  ;;  %v3031_v39 = vld [vmem:[%s4277_s3 + $0x218] sm:$0xff]  }
 0x10c   :  { %v467_v56 = vpop.f32.mrf.mxu1  ;;  %v3771_v58 = vpop.f32.mrf.mxu0 }
 0x10d   :  { %v1024_v59 = vpack.c.bf16 %v464_v54, %v458_v47  ;;  %v468_v8 = vadd.f32 %v467_v56, %v3597_v37  ;;  %v986_v30 = vpack.c.bf16 %v577_v9, %v571_v11  ;;  %v985_v45 = vpack.c.bf16 %v575_v25, %v569_v7  ;;  %v3034_v9 = vld [vmem:[%s4277_s3 + $0x248] sm:$0xff]  }
 0x10e   :  { %v469_v5 = vpop.f32.mrf.mxu1  ;;  %v582_v57 = vpop.f32.mrf.mxu0  ;;  %v581_v11 = vadd.f32 %v3771_v58, %v3757_v2  ;;  %v3035_v58 = vld [vmem:[%s4277_s3 + $0x208] sm:$0xff]  }
 0x10f   :  { %1865 = vmatprep.mubr.bf16.mxu0 %v1024_v59  ;;  %v470_v3 = vadd.f32 %v469_v5, %v3600_v40  ;;  %v583_v38 = vadd.f32 %v582_v57, %v3739_v18  ;;  %v3032_v59 = vld [vmem:[%s4277_s3 + $0x250] sm:$0xff]  }
 0x110   :  { %v473_v10 = vpop.f32.mrf.mxu1  ;;  %1866 = vmatmul.mubr.bf16.gmra.mxu0 %v1023_v55  ;;  %1915 = vmatmul.mubr.bf16.vlgmr.msra.gmra.mxu1 %v965_v1  ;;  %v3782_v14 = vpop.f32.mrf.mxu0 }
 0x111   :  { %v474_v15 = vadd.f32 %v473_v10, %v3597_v37  ;;  %2844 = vmatpush3.bf16.msra.mxu1 %v3016_v61  ;;  %1922 = vmatprep.mubr.bf16.mxu1 %v976_v60  ;;  %v3026_v37 = vld [vmem:[%s4277_s3 + $0x268] sm:$0xff]   ;;  %v3033_v10 = vld [vmem:[%s4277_s3 + $0x210] sm:$0xff]   ;;  %v587_v13 = vadd.f32 %v3782_v14, %v3757_v2 }
 0x112   :  { %v475_v22 = vpop.f32.mrf.mxu1  ;;  %2845 = vmatprep.subr.bf16.mxu1 %v3020_v46  ;;  %v588_v6 = vpop.f32.mrf.mxu0 }
 0x113   :  { %v476_v24 = vadd.f32 %v475_v22, %v3600_v40  ;;  %v1033_v26 = vpack.c.bf16 %v474_v15, %v468_v8  ;;  %v589_v17 = vadd.f32 %v588_v6, %v3739_v18  ;;  %v995_v14 = vpack.c.bf16 %v587_v13, %v581_v11 }
 0x114   :  { %v705_v28 = vpop.f32.mrf.mxu1  ;;  %v3802_v29 = vpop.f32.mrf.mxu0 }
 0x115   :  { %v1034_v16 = vpack.c.bf16 %v476_v24, %v470_v3  ;;  %2846 = vmatpush3.bf16.msra.mxu1 %v3022_v20  ;;  %v706_v36 = vadd.f32 %v705_v28, %v3800_v27  ;;  %v996_v54 = vpack.c.bf16 %v589_v17, %v583_v38 }
 0x116   :  { %v707_v34 = vpop.f32.mrf.mxu1  ;;  %2847 = vmatprep.subr.bf16.mxu1 %v3026_v37  ;;  %v594_v40 = vpop.f32.mrf.mxu0 }
 0x117   :  { %1873 = vmatprep.mubr.bf16.mxu0 %v1034_v16  ;;  %v708_v42 = vadd.f32 %v707_v34, %v3805_v31  ;;  %v595_v61 = vadd.f32 %v594_v40, %v3739_v18 }
 0x118   :  { %v711_v4 = vpop.f32.mrf.mxu1  ;;  %1874 = vmatmul.mubr.bf16.gmra.mxu0 %v1033_v26  ;;  %1923 = vmatmul.mubr.bf16.gmra.mxu1 %v975_v33  ;;  %v3815_v41 = vpop.f32.mrf.mxu0  ;;  %v3036_v26 = vld [vmem:[%s4277_s3 + $0x240] sm:$0xff]  }
 0x119   :  { %v712_v43 = vadd.f32 %v711_v4, %v3800_v27  ;;  %1930 = vmatprep.mubr.bf16.mxu1 %v986_v30  ;;  %2848 = vmatpush3.bf16.msra.mxu1 %v3027_v32  ;;  %v599_v38 = vadd.f32 %v3815_v41, %v3757_v2 }
 0x11a   :  { %v713_v47 = vpop.f32.mrf.mxu1  ;;  %v600_v48 = vpop.f32.mrf.mxu0  ;;  %2849 = vmatprep.subr.bf16.mxu1 %v3028_v35  ;;  %v3037_v35 = vld [vmem:[%s4277_s3 + $0x200] sm:$0xff]  }
 0x11b   :  { %v714_v12 = vadd.f32 %v713_v47, %v3805_v31  ;;  %v967_v50 = vpack.c.bf16 %v712_v43, %v706_v36  ;;  %v601_v8 = vadd.f32 %v600_v48, %v3739_v18  ;;  %v593_v36 = vadd.f32 %v3802_v29, %v3757_v2 }
 0x11c   :  { %v717_v51 = vpop.f32.mrf.mxu1  ;;  %v3831_v52 = vpop.f32.mrf.mxu0 }
 0x11d   :  { %v968_v53 = vpack.c.bf16 %v714_v12, %v708_v42  ;;  %2850 = vmatpush3.bf16.msra.mxu1 %v3029_v44  ;;  %v718_v60 = vadd.f32 %v717_v51, %v3800_v27  ;;  %v1006_v6 = vpack.c.bf16 %v601_v8, %v595_v61  ;;  %v1005_v48 = vpack.c.bf16 %v599_v38, %v593_v36 }
 0x11e   :  { %v719_v55 = vpop.f32.mrf.mxu1  ;;  %v606_v56 = vpop.f32.mrf.mxu0  ;;  %2851 = vmatprep.subr.bf16.mxu1 %v3030_v49 }
 0x11f   :  { %2011 = vmatprep.mubr.bf16.mxu0 %v968_v53  ;;  %v720_v46 = vadd.f32 %v719_v55, %v3805_v31  ;;  %v607_v16 = vadd.f32 %v606_v56, %v3739_v18 }
 0x120   :  { %v723_v1 = vpop.f32.mrf.mxu1  ;;  %1931 = vmatmul.mubr.bf16.gmra.mxu1 %v985_v45  ;;  %2012 = vmatmul.mubr.bf16.vlgmr.msra.gmra.mxu0 %v967_v50  ;;  %v3841_v5 = vpop.f32.mrf.mxu0  ;;  %v605_v45 = vadd.f32 %v3831_v52, %v3757_v2 }
 0x121   :  { %v724_v57 = vadd.f32 %v723_v1, %v3800_v27  ;;  %1938 = vmatprep.mubr.bf16.mxu1 %v996_v54  ;;  %2852 = vmatpush3.bf16.msra.mxu1 %v3031_v39  ;;  %v611_v55 = vadd.f32 %v3841_v5, %v3757_v2 }
 0x122   :  { %v725_v3 = vpop.f32.mrf.mxu1  ;;  %v612_v15 = vpop.f32.mrf.mxu0  ;;  %2853 = vmatprep.subr.bf16.mxu1 %v3032_v59 }
 0x123   :  { %v726_v19 = vadd.f32 %v725_v3, %v3805_v31  ;;  %v977_v20 = vpack.c.bf16 %v724_v57, %v718_v60  ;;  %v613_v40 = vadd.f32 %v612_v15, %v3739_v18 }
 0x124   :  { %v729_v21 = vpop.f32.mrf.mxu1  ;;  %v3857_v23 = vpop.f32.mrf.mxu0 }
 0x125   :  { %v978_v22 = vpack.c.bf16 %v726_v19, %v720_v46  ;;  %2854 = vmatpush3.bf16.msra.mxu1 %v3033_v10  ;;  %v730_v28 = vadd.f32 %v729_v21, %v3800_v27  ;;  %v1016_v47 = vpack.c.bf16 %v613_v40, %v607_v16  ;;  %v1015_v10 = vpack.c.bf16 %v611_v55, %v605_v45 }
 0x126   :  { %v731_v37 = vpop.f32.mrf.mxu1  ;;  %v618_v24 = vpop.f32.mrf.mxu0  ;;  %2855 = vmatprep.subr.bf16.mxu1 %v3034_v9  ;;  %v617_v21 = vadd.f32 %v3857_v23, %v3757_v2 }
 0x127   :  { %2019 = vmatprep.mubr.bf16.mxu0 %v978_v22  ;;  %v732_v33 = vadd.f32 %v731_v37, %v3805_v31  ;;  %v619_v53 = vadd.f32 %v618_v24, %v3739_v18 }
 0x128   :  { %v735_v30 = vpop.f32.mrf.mxu1  ;;  %1939 = vmatmul.mubr.bf16.gmra.mxu1 %v995_v14  ;;  %2020 = vmatmul.mubr.bf16.gmra.mxu0 %v977_v20  ;;  %v622_v32 = vpop.f32.mrf.mxu0 }
 0x129   :  { %v736_v34 = vadd.f32 %v735_v30, %v3800_v27  ;;  %1946 = vmatprep.mubr.bf16.mxu1 %v1006_v6  ;;  %2856 = vmatpush3.bf16.msra.mxu1 %v3035_v58  ;;  %v623_v22 = vadd.f32 %v622_v32, %v3757_v2  ;;  %v54_v58 = vld [vmem:[%s4278_s2 + $0x8] sm:$0x3] }
 0x12a   :  { %v737_v4 = vpop.f32.mrf.mxu1  ;;  %v624_v42 = vpop.f32.mrf.mxu0  ;;  %2857 = vmatprep.subr.bf16.mxu1 %v3036_v26 }
 0x12b   :  { %v738_v43 = vadd.f32 %v737_v4, %v3805_v31  ;;  %v987_v17 = vpack.c.bf16 %v736_v34, %v730_v28  ;;  %v625_v39 = vadd.f32 %v624_v42, %v3739_v18  ;;  %v1025_v23 = vpack.c.bf16 %v623_v22, %v617_v21 }
 0x12c   :  { %v741_v44 = vpop.f32.mrf.mxu1  ;;  %v3878_v7 = vpop.f32.mrf.mxu0 }
 0x12d   :  { %v988_v25 = vpack.c.bf16 %v738_v43, %v732_v33  ;;  %2858 = vmatpush3.bf16.msra.mxu1 %v3037_v35  ;;  %v742_v29 = vadd.f32 %v741_v44, %v3800_v27  ;;  %v1026_v8 = vpack.c.bf16 %v625_v39, %v619_v53  ;;  %v629_v42 = vadd.f32 %v3878_v7, %v3757_v2 }
 0x12e   :  { %v743_v49 = vpop.f32.mrf.mxu1  ;;  %v630_v12 = vpop.f32.mrf.mxu0 }
 0x12f   :  { %2027 = vmatprep.mubr.bf16.mxu0 %v988_v25  ;;  %v744_v51 = vadd.f32 %v743_v49, %v3805_v31  ;;  %v631_v9 = vadd.f32 %v630_v12, %v3739_v18 }
 0x130   :  { %v747_v50 = vpop.f32.mrf.mxu1  ;;  %1947 = vmatmul.mubr.bf16.gmra.mxu1 %v1005_v48  ;;  %2028 = vmatmul.mubr.bf16.gmra.mxu0 %v987_v17  ;;  %v634_v41 = vpop.f32.mrf.mxu0 }
 0x131   :  { %v748_v54 = vadd.f32 %v747_v50, %v3800_v27  ;;  %1954 = vmatprep.mubr.bf16.mxu1 %v1016_v47  ;;  %v635_v43 = vadd.f32 %v634_v41, %v3757_v2 }
 0x132   :  { %v749_v56 = vpop.f32.mrf.mxu1  ;;  %v636_v59 = vpop.f32.mrf.mxu0 }
 0x133   :  { %v750_v60 = vadd.f32 %v749_v56, %v3805_v31  ;;  %v997_v61 = vpack.c.bf16 %v748_v54, %v742_v29  ;;  %v637_v20 = vadd.f32 %v636_v59, %v3739_v18  ;;  %v3908_v18 = vrot.slane %v54_v58, %v63_v63 }
 0x134   :  { %v753_v1 = vpop.f32.mrf.mxu1  ;;  %v3890_v46 = vpop.f32.mrf.mxu0  ;;  %v1035_v50 = vpack.c.bf16 %v635_v43, %v629_v42 }
 0x135   :  { %v998_v57 = vpack.c.bf16 %v750_v60, %v744_v51  ;;  %v754_v3 = vadd.f32 %v753_v1, %v3800_v27  ;;  %v1036_v30 = vpack.c.bf16 %v637_v20, %v631_v9  ;;  %v3921_v51 = vrot.slane %v54_v58, %v59_v0 }
 0x136   :  { %v755_v11 = vpop.f32.mrf.mxu1  ;;  %v868_v13 = vpop.f32.mrf.mxu0 }
 0x137   :  { %2035 = vmatprep.mubr.bf16.mxu0 %v998_v57  ;;  %v756_v15 = vadd.f32 %v755_v11, %v3805_v31  ;;  %v869_v4 = vadd.f32 %v868_v13, %v3908_v18  ;;  %v867_v0 = vadd.f32 %v3890_v46, %v3921_v51 }
 0x138   :  { %v759_v52 = vpop.f32.mrf.mxu1  ;;  %1955 = vmatmul.mubr.bf16.gmra.mxu1 %v1015_v10  ;;  %2036 = vmatmul.mubr.bf16.gmra.mxu0 %v997_v61  ;;  %v872_v5 = vpop.f32.mrf.mxu0 }
 0x139   :  { %v760_v19 = vadd.f32 %v759_v52, %v3800_v27  ;;  %1962 = vmatprep.mubr.bf16.mxu1 %v1026_v8  ;;  %v873_v56 = vadd.f32 %v872_v5, %v3921_v51 }
 0x13a   :  { %v761_v6 = vpop.f32.mrf.mxu1  ;;  %v874_v14 = vpop.f32.mrf.mxu0 }
 0x13b   :  { %v762_v37 = vadd.f32 %v761_v6, %v3805_v31  ;;  %v1007_v24 = vpack.c.bf16 %v760_v19, %v754_v3  ;;  %v875_v63 = vadd.f32 %v874_v14, %v3908_v18  ;;  %v969_v13 = vpack.c.bf16 %v873_v56, %v867_v0 }
 0x13c   :  { %v765_v26 = vpop.f32.mrf.mxu1  ;;  %v3904_v28 = vpop.f32.mrf.mxu0 }
 0x13d   :  { %v1008_v16 = vpack.c.bf16 %v762_v37, %v756_v15  ;;  %v766_v34 = vadd.f32 %v765_v26, %v3800_v27  ;;  %v970_v29 = vpack.c.bf16 %v875_v63, %v869_v4  ;;  %v879_v22 = vadd.f32 %v3904_v28, %v3921_v51 }
 0x13e   :  { %v767_v32 = vpop.f32.mrf.mxu1  ;;  %v880_v33 = vpop.f32.mrf.mxu0 }
 0x13f   :  { %2043 = vmatprep.mubr.bf16.mxu0 %v1008_v16  ;;  %v768_v36 = vadd.f32 %v767_v32, %v3805_v31  ;;  %v881_v55 = vadd.f32 %v880_v33, %v3908_v18 }
 0x140   :  { %v771_v40 = vpop.f32.mrf.mxu1  ;;  %1963 = vmatmul.mubr.bf16.gmra.mxu1 %v1025_v23  ;;  %2044 = vmatmul.mubr.bf16.gmra.mxu0 %v1007_v24  ;;  %v884_v35 = vpop.f32.mrf.mxu0 }
 0x141   :  { %v772_v38 = vadd.f32 %v771_v40, %v3800_v27  ;;  %1970 = vmatprep.mubr.bf16.mxu1 %v1036_v30  ;;  %v885_v6 = vadd.f32 %v884_v35, %v3921_v51 }
 0x142   :  { %v773_v17 = vpop.f32.mrf.mxu1  ;;  %v886_v44 = vpop.f32.mrf.mxu0 }
 0x143   :  { %v774_v25 = vadd.f32 %v773_v17, %v3805_v31  ;;  %v1017_v47 = vpack.c.bf16 %v772_v38, %v766_v34  ;;  %v887_v62 = vadd.f32 %v886_v44, %v3908_v18  ;;  %v979_v23 = vpack.c.bf16 %v885_v6, %v879_v22 }
 0x144   :  { %v777_v48 = vpop.f32.mrf.mxu1  ;;  %v890_v49 = vpop.f32.mrf.mxu0 }
 0x145   :  { %v1018_v12 = vpack.c.bf16 %v774_v25, %v768_v36  ;;  %v778_v7 = vadd.f32 %v777_v48, %v3800_v27  ;;  %v980_v11 = vpack.c.bf16 %v887_v62, %v881_v55  ;;  %v891_v34 = vadd.f32 %v890_v49, %v3921_v51 }
 0x146   :  { %v779_v53 = vpop.f32.mrf.mxu1  ;;  %v892_v54 = vpop.f32.mrf.mxu0 }
 0x147   :  { %2051 = vmatprep.mubr.bf16.mxu0 %v1018_v12  ;;  %v780_v39 = vadd.f32 %v779_v53, %v3805_v31  ;;  %v893_v20 = vadd.f32 %v892_v54, %v3908_v18 }
 0x148   :  { %v783_v2 = vpop.f32.mrf.mxu1  ;;  %1971 = vmatmul.mubr.bf16.gmra.mxu1 %v1035_v50  ;;  %2052 = vmatmul.mubr.bf16.gmra.mxu0 %v1017_v47  ;;  %v896_v41 = vpop.f32.mrf.mxu0 }
 0x149   :  { %v784_v45 = vadd.f32 %v783_v2, %v3800_v27  ;;  %2108 = vmatprep.mubr.bf16.mxu1 %v970_v29  ;;  %v897_v40 = vadd.f32 %v896_v41, %v3921_v51 }
 0x14a   :  { %v785_v59 = vpop.f32.mrf.mxu1  ;;  %v898_v60 = vpop.f32.mrf.mxu0 }
 0x14b   :  { %v786_v61 = vadd.f32 %v785_v59, %v3805_v31  ;;  %v1027_v1 = vpack.c.bf16 %v784_v45, %v778_v7  ;;  %v899_v21 = vadd.f32 %v898_v60, %v3908_v18  ;;  %v989_v38 = vpack.c.bf16 %v897_v40, %v891_v34 }
 0x14c   :  { %v789_v57 = vpop.f32.mrf.mxu1  ;;  %v902_v8 = vpop.f32.mrf.mxu0 }
 0x14d   :  { %v1028_v10 = vpack.c.bf16 %v786_v61, %v780_v39  ;;  %v790_v15 = vadd.f32 %v789_v57, %v3800_v27  ;;  %v990_v30 = vpack.c.bf16 %v899_v21, %v893_v20  ;;  %v903_v17 = vadd.f32 %v902_v8, %v3921_v51  ;;  %v3041_v21 = vld [vmem:[%s4279_s5 + $0x20] sm:$0xff]  }
 0x14e   :  { %v791_v3 = vpop.f32.mrf.mxu1  ;;  %v904_v52 = vpop.f32.mrf.mxu0 }
 0x14f   :  { %2059 = vmatprep.mubr.bf16.mxu0 %v1028_v10  ;;  %v792_v5 = vadd.f32 %v791_v3, %v3805_v31  ;;  %v905_v33 = vadd.f32 %v904_v52, %v3908_v18 }
 0x150   :  { %v795_v9 = vpop.f32.mrf.mxu1  ;;  %2060 = vmatmul.mubr.bf16.gmra.mxu0 %v1027_v1  ;;  %2109 = vmatmul.mubr.bf16.vlgmr.msra.gmra.mxu1 %v969_v13  ;;  %v908_v46 = vpop.f32.mrf.mxu0 }
 0x151   :  { %v796_v19 = vadd.f32 %v795_v9, %v3800_v27  ;;  %2116 = vmatprep.mubr.bf16.mxu1 %v980_v11  ;;  %v909_v44 = vadd.f32 %v908_v46, %v3921_v51  ;;  %v3038_v46 = vld [vmem:[%s4279_s5 + $0x38] sm:$0xff]  }
 0x152   :  { %v797_v58 = vpop.f32.mrf.mxu1  ;;  %v910_v14 = vpop.f32.mrf.mxu0  ;;  %2923 = vmatprep.subr.bf16.mxu0 %v3038_v46 }
 0x153   :  { %v798_v37 = vadd.f32 %v797_v58, %v3805_v31  ;;  %v1037_v24 = vpack.c.bf16 %v796_v19, %v790_v15  ;;  %v911_v28 = vadd.f32 %v910_v14, %v3908_v18  ;;  %v999_v49 = vpack.c.bf16 %v909_v44, %v903_v17  ;;  %2924 = vmatpush3.bf16.msra.mxu0 %v3038_v46  ;;  %v3040_v19 = vld [vmem:[%s4279_s5 + $0x28] sm:$0xff]   ;;  %v3042_v14 = vld [vmem:[%s4279_s5 + $0x18] sm:$0xff]  }
 0x154   :  { %v914_v26 = vpop.f32.mrf.mxu0 }
 0x155   :  { %v1038_v16 = vpack.c.bf16 %v798_v37, %v792_v5  ;;  %v1000_v36 = vpack.c.bf16 %v911_v28, %v905_v33  ;;  %v915_v54 = vadd.f32 %v914_v26, %v3921_v51  ;;  %v3991_v28 = vld [vmem:[%s4280_s4] ss:$0 sm:$0xff] }
 0x156   :  { %v916_v27 = vpop.f32.mrf.mxu0 }
 0x157   :  { %2067 = vmatprep.mubr.bf16.mxu0 %v1038_v16  ;;  %v917_v42 = vadd.f32 %v916_v27, %v3908_v18  ;;  %v3043_v16 = vld [vmem:[%s4279_s5 + $0x10] sm:$0xff]  }
 0x158   :  { %2068 = vmatmul.mubr.bf16.gmra.mxu0 %v1037_v24  ;;  %2117 = vmatmul.mubr.bf16.gmra.mxu1 %v979_v23  ;;  %v920_v32 = vpop.f32.mrf.mxu0 }
 0x159   :  { %2124 = vmatprep.mubr.bf16.mxu1 %v990_v30  ;;  %v921_v7 = vadd.f32 %v920_v32, %v3921_v51  ;;  %v3044_v32 = vld [vmem:[%s4279_s5 + $0x8] sm:$0xff]  }
 0x15a   :  { %v922_v31 = vpop.f32.mrf.mxu0 }
 0x15b   :  { %v923_v43 = vadd.f32 %v922_v31, %v3908_v18  ;;  %v1009_v45 = vpack.c.bf16 %v921_v7, %v915_v54 }
 0x15c   :  { %v926_v35 = vpop.f32.mrf.mxu0 }
 0x15d   :  { %v1010_v48 = vpack.c.bf16 %v923_v43, %v917_v42  ;;  %v927_v56 = vadd.f32 %v926_v35, %v3921_v51 }
 0x15e   :  { %v928_v4 = vpop.f32.mrf.mxu0 }
 0x15f   :  { %v929_v50 = vadd.f32 %v928_v4, %v3908_v18 }
 0x160   :  { %2125 = vmatmul.mubr.bf16.gmra.mxu1 %v989_v38  ;;  %v932_v63 = vpop.f32.mrf.mxu0 }
 0x161   :  { %2132 = vmatprep.mubr.bf16.mxu1 %v1000_v36  ;;  %v933_v59 = vadd.f32 %v932_v63, %v3921_v51  ;;  %v3045_v36 = vld [vmem:[%s4279_s5] sm:$0xff]  }
 0x162   :  { %v934_v25 = vpop.f32.mrf.mxu0 }
 0x163   :  { %v935_v53 = vadd.f32 %v934_v25, %v3908_v18  ;;  %v1019_v1 = vpack.c.bf16 %v933_v59, %v927_v56 }
 0x164   :  { %v938_v47 = vpop.f32.mrf.mxu0 }
 0x165   :  { %v1020_v39 = vpack.c.bf16 %v935_v53, %v929_v50  ;;  %v939_v11 = vadd.f32 %v938_v47, %v3921_v51 }
 0x166   :  { %v940_v12 = vpop.f32.mrf.mxu0 }
 0x167   :  { %v941_v62 = vadd.f32 %v940_v12, %v3908_v18 }
 0x168   :  { %2133 = vmatmul.mubr.bf16.gmra.mxu1 %v999_v49  ;;  %v944_v29 = vpop.f32.mrf.mxu0 }
 0x169   :  { %2140 = vmatprep.mubr.bf16.mxu1 %v1010_v48  ;;  %v945_v13 = vadd.f32 %v944_v29, %v3921_v51 }
 0x16a   :  { %v946_v2 = vpop.f32.mrf.mxu0 }
 0x16b   :  { %v947_v0 = vadd.f32 %v946_v2, %v3908_v18  ;;  %v1029_v52 = vpack.c.bf16 %v945_v13, %v939_v11 }
 0x16c   :  { %v950_v41 = vpop.f32.mrf.mxu0 }
 0x16d   :  { %v1030_v61 = vpack.c.bf16 %v947_v0, %v941_v62  ;;  %v951_v15 = vadd.f32 %v950_v41, %v3921_v51 }
 0x16e   :  { %v952_v55 = vpop.f32.mrf.mxu0 }
 0x16f   :  { %v953_v8 = vadd.f32 %v952_v55, %v3908_v18 }
 0x170   :  { %2141 = vmatmul.mubr.bf16.gmra.mxu1 %v1009_v45  ;;  %v956_v60 = vpop.f32.mrf.mxu0 }
 0x171   :  { %2148 = vmatprep.mubr.bf16.mxu1 %v1020_v39  ;;  %v957_v9 = vadd.f32 %v956_v60, %v3921_v51 }
 0x172   :  { %v958_v57 = vpop.f32.mrf.mxu0 }
 0x173   :  { %v959_v10 = vadd.f32 %v958_v57, %v3908_v18  ;;  %v1039_v5 = vpack.c.bf16 %v957_v9, %v951_v15  ;;  %v3039_v18 = vld [vmem:[%s4279_s5 + $0x30] sm:$0xff]  }
 0x174   :  { %2925 = vmatprep.subr.bf16.mxu0 %v3039_v18 }
 0x175   :  { %v1040_v3 = vpack.c.bf16 %v959_v10, %v953_v8  ;;  %2926 = vmatpush3.bf16.msra.mxu0 %v3039_v18 }
 0x176   :  { %2927 = vmatprep.subr.bf16.mxu0 %v3040_v19 }
 0x178   :  { %2149 = vmatmul.mubr.bf16.gmra.mxu1 %v1019_v1 }
 0x179   :  { %2156 = vmatprep.mubr.bf16.mxu1 %v1030_v61  ;;  %2928 = vmatpush3.bf16.msra.mxu0 %v3040_v19 }
 0x17a   :  { %2929 = vmatprep.subr.bf16.mxu0 %v3041_v21 }
 0x17d   :  { %2930 = vmatpush3.bf16.msra.mxu0 %v3041_v21 }
 0x17e   :  { %2931 = vmatprep.subr.bf16.mxu0 %v3042_v14 }
 0x180   :  { %2157 = vmatmul.mubr.bf16.gmra.mxu1 %v1029_v52 }
 0x181   :  { %2164 = vmatprep.mubr.bf16.mxu1 %v1040_v3  ;;  %2932 = vmatpush3.bf16.msra.mxu0 %v3042_v14 }
 0x182   :  { %2933 = vmatprep.subr.bf16.mxu0 %v3043_v16 }
 0x185   :  { %2934 = vmatpush3.bf16.msra.mxu0 %v3043_v16 }
 0x186   :  { %2935 = vmatprep.subr.bf16.mxu0 %v3044_v32 }
 0x188   :  { %2165 = vmatmul.mubr.bf16.gmra.mxu1 %v1039_v5 }
 0x189   :  { %2936 = vmatpush3.bf16.msra.mxu0 %v3044_v32 }
 0x18a   :  { %2937 = vmatprep.subr.bf16.mxu0 %v3045_v36 }
 0x18d   :  { %2938 = vmatpush3.bf16.msra.mxu0 %v3045_v36 }
 0x190   :  { %v2603_v20 = vpop.f32.mrf.mxu1 }
 0x192   :  { %v2604_v51 = vpop.f32.mrf.mxu1 }
 0x193   :  { %v2605_v22 = vadd.f32 %v2604_v51, %v2603_v20 }
 0x194   :  { %v2606_v6 = vpop.f32.mrf.mxu1 }
 0x195   :  { %v1723_v38 = vadd.f32 %v2605_v22, %v3991_v28 }
 0x196   :  { %v2607_v58 = vpop.f32.mrf.mxu1 }
 0x197   :  { %v3978_v37 = vadd.f32 %v2607_v58, %v2606_v6 }
 0x198   :  { %v2609_v24 = vpop.f32.mrf.mxu1 }
 0x19a   :  { %v2610_v26 = vpop.f32.mrf.mxu1 }
 0x19b   :  { %v2611_v30 = vadd.f32 %v2610_v26, %v2609_v24 }
 0x19c   :  { %v2612_v23 = vpop.f32.mrf.mxu1 }
 0x19d   :  { %v1731_v50 = vadd.f32 %v2611_v30, %v3991_v28 }
 0x19e   :  { %v2613_v27 = vpop.f32.mrf.mxu1 }
 0x19f   :  { %v3986_v33 = vadd.f32 %v2613_v27, %v2612_v23 }
 0x1a0   :  { %v2615_v34 = vpop.f32.mrf.mxu1  ;;  %v2667_v40 = vpop.f32.mrf.mxu0 }
 0x1a2   :  { %v2616_v31 = vpop.f32.mrf.mxu1  ;;  %v2668_v35 = vpop.f32.mrf.mxu0 }
 0x1a3   :  { %v2617_v4 = vadd.f32 %v2616_v31, %v2615_v34  ;;  %v2669_v63 = vadd.f32 %v2668_v35, %v2667_v40 }
 0x1a4   :  { %v2618_v42 = vpop.f32.mrf.mxu1  ;;  %v3997_v43 = vpop.f32.mrf.mxu0 }
 0x1a5   :  { %v3999_v17 = vadd.f32 %v2669_v63, %v1723_v38  ;;  %v1739_v60 = vadd.f32 %v2617_v4, %v3991_v28 }
 0x1a6   :  { %v2619_v44 = vpop.f32.mrf.mxu1  ;;  %v4001_v25 = vpop.f32.mrf.mxu0 }
 0x1a7   :  { %v4003_v47 = vadd.f32 %v2619_v44, %v2618_v42 }
 0x1a8   :  { %v2621_v48 = vpop.f32.mrf.mxu1  ;;  %v2673_v49 = vpop.f32.mrf.mxu0 }
 0x1aa   :  { %v2622_v12 = vpop.f32.mrf.mxu1  ;;  %v2674_v29 = vpop.f32.mrf.mxu0 }
 0x1ab   :  { %v2623_v53 = vadd.f32 %v2622_v12, %v2621_v48  ;;  %v2675_v54 = vadd.f32 %v2674_v29, %v2673_v49 }
 0x1ac   :  { %v2624_v7 = vpop.f32.mrf.mxu1  ;;  %v4006_v2 = vpop.f32.mrf.mxu0 }
 0x1ad   :  { %v4008_v41 = vadd.f32 %v2675_v54, %v1731_v50  ;;  %v1747_v5 = vadd.f32 %v2623_v53, %v3991_v28 }
 0x1ae   :  { %v2625_v39 = vpop.f32.mrf.mxu1  ;;  %v4010_v45 = vpop.f32.mrf.mxu0 }
 0x1af   :  { %v4012_v55 = vadd.f32 %v2625_v39, %v2624_v7 }
 0x1b0   :  { %v2627_v62 = vpop.f32.mrf.mxu1  ;;  %v2679_v0 = vpop.f32.mrf.mxu0 }
 0x1b2   :  { %v2628_v56 = vpop.f32.mrf.mxu1  ;;  %v2680_v59 = vpop.f32.mrf.mxu0 }
 0x1b3   :  { %v2629_v61 = vadd.f32 %v2628_v56, %v2627_v62  ;;  %v2681_v1 = vadd.f32 %v2680_v59, %v2679_v0 }
 0x1b4   :  { %v2630_v57 = vpop.f32.mrf.mxu1  ;;  %v4015_v8 = vpop.f32.mrf.mxu0 }
 0x1b5   :  { %v4017_v10 = vadd.f32 %v2681_v1, %v1739_v60  ;;  %v1755_v30 = vadd.f32 %v2629_v61, %v3991_v28 }
 0x1b6   :  { %v2631_v11 = vpop.f32.mrf.mxu1  ;;  %v4019_v13 = vpop.f32.mrf.mxu0 }
 0x1b7   :  { %v4021_v3 = vadd.f32 %v2631_v11, %v2630_v57 }
 0x1b8   :  { %v2633_v52 = vpop.f32.mrf.mxu1  ;;  %v2685_v15 = vpop.f32.mrf.mxu0 }
 0x1ba   :  { %v2634_v9 = vpop.f32.mrf.mxu1  ;;  %v2686_v46 = vpop.f32.mrf.mxu0 }
 0x1bb   :  { %v2635_v18 = vadd.f32 %v2634_v9, %v2633_v52  ;;  %v2687_v19 = vadd.f32 %v2686_v46, %v2685_v15 }
 0x1bc   :  { %v2636_v20 = vpop.f32.mrf.mxu1  ;;  %v4024_v51 = vpop.f32.mrf.mxu0 }
 0x1bd   :  { %v4026_v21 = vadd.f32 %v2687_v19, %v1747_v5  ;;  %v1763_v44 = vadd.f32 %v2635_v18, %v3991_v28 }
 0x1be   :  { %v2637_v22 = vpop.f32.mrf.mxu1  ;;  %v4028_v6 = vpop.f32.mrf.mxu0 }
 0x1bf   :  { %v4030_v58 = vadd.f32 %v2637_v22, %v2636_v20 }
 0x1c0   :  { %v2639_v14 = vpop.f32.mrf.mxu1  ;;  %v2691_v24 = vpop.f32.mrf.mxu0 }
 0x1c1   :  { %4283 = vst [vmem:[#allocation2_spill] sm:$0xff] %v4030_v58 }
 0x1c2   :  { %v2640_v26 = vpop.f32.mrf.mxu1  ;;  %v2692_v16 = vpop.f32.mrf.mxu0 }
 0x1c3   :  { %v2641_v23 = vadd.f32 %v2640_v26, %v2639_v14  ;;  %v2693_v27 = vadd.f32 %v2692_v16, %v2691_v24 }
 0x1c4   :  { %v2642_v32 = vpop.f32.mrf.mxu1  ;;  %v4033_v34 = vpop.f32.mrf.mxu0 }
 0x1c5   :  { %v4035_v40 = vadd.f32 %v2693_v27, %v1755_v30  ;;  %v1771_v59 = vadd.f32 %v2641_v23, %v3991_v28 }
 0x1c6   :  { %v2643_v31 = vpop.f32.mrf.mxu1  ;;  %v4037_v35 = vpop.f32.mrf.mxu0 }
 0x1c7   :  { %v4039_v36 = vadd.f32 %v2643_v31, %v2642_v32 }
 0x1c8   :  { %v2645_v38 = vpop.f32.mrf.mxu1  ;;  %v2697_v4 = vpop.f32.mrf.mxu0 }
 0x1c9   :  { %4284 = vst [vmem:[#allocation3_spill] sm:$0xff] %v4039_v36 }
 0x1ca   :  { %v2646_v63 = vpop.f32.mrf.mxu1  ;;  %v2698_v42 = vpop.f32.mrf.mxu0 }
 0x1cb   :  { %v2647_v48 = vadd.f32 %v2646_v63, %v2645_v38  ;;  %v2699_v49 = vadd.f32 %v2698_v42, %v2697_v4 }
 0x1cc   :  { %v2648_v12 = vpop.f32.mrf.mxu1  ;;  %v4042_v29 = vpop.f32.mrf.mxu0 }
 0x1cd   :  { %v4044_v50 = vadd.f32 %v2699_v49, %v1763_v44  ;;  %v1779_v20 = vadd.f32 %v2647_v48, %v3991_v28 }
 0x1ce   :  { %v2649_v53 = vpop.f32.mrf.mxu1  ;;  %v4046_v54 = vpop.f32.mrf.mxu0 }
 0x1cf   :  { %4285 = vst [vmem:[#allocation4_spill] sm:$0xff] %v4046_v54  ;;  %v4048_v7 = vadd.f32 %v2649_v53, %v2648_v12 }
 0x1d0   :  { %v2703_v39 = vpop.f32.mrf.mxu0  ;;  %v2731_v62 = vpop.f32.mrf.mxu1 }
 0x1d1   :  { %4286 = vst [vmem:[#allocation5_spill] sm:$0xff] %v4048_v7 }
 0x1d2   :  { %v2704_v0 = vpop.f32.mrf.mxu0  ;;  %v2732_v56 = vpop.f32.mrf.mxu1 }
 0x1d3   :  { %v2705_v60 = vadd.f32 %v2704_v0, %v2703_v39  ;;  %v2733_v61 = vadd.f32 %v2732_v56, %v2731_v62 }
 0x1d4   :  { %v4051_v1 = vpop.f32.mrf.mxu0  ;;  %v4053_v57 = vpop.f32.mrf.mxu1 }
 0x1d5   :  { %4287 = vst [vmem:[#allocation6_spill] sm:$0xff] %v4051_v1  ;;  %v1868_v11 = vadd.f32 %v2705_v60, %v1771_v59  ;;  %v4056_v52 = vadd.f32 %v2733_v61, %v3999_v17 }
 0x1d6   :  { %v4058_v15 = vpop.f32.mrf.mxu0  ;;  %v4060_v9 = vpop.f32.mrf.mxu1 }
 0x1d7   :  { %4288 = vst [vmem:[#allocation7_spill] sm:$0xff] %v4058_v15 }
 0x1d8   :  { %v2709_v46 = vpop.f32.mrf.mxu0  ;;  %v2737_v5 = vpop.f32.mrf.mxu1 }
 0x1da   :  { %v2710_v18 = vpop.f32.mrf.mxu0  ;;  %v2738_v19 = vpop.f32.mrf.mxu1 }
 0x1db   :  { %v2711_v22 = vadd.f32 %v2710_v18, %v2709_v46  ;;  %v2739_v14 = vadd.f32 %v2738_v19, %v2737_v5 }
 0x1dc   :  { %v4063_v24 = vpop.f32.mrf.mxu0  ;;  %v4065_v26 = vpop.f32.mrf.mxu1 }
 0x1dd   :  { %4289 = vst [vmem:[#allocation8_spill] sm:$0xff] %v4063_v24  ;;  %v1876_v16 = vadd.f32 %v2711_v22, %v1779_v20  ;;  %v4068_v17 = vadd.f32 %v2739_v14, %v4008_v41 }
 0x1de   :  { %v4070_v30 = vpop.f32.mrf.mxu0  ;;  %v4072_v23 = vpop.f32.mrf.mxu1 }
 0x1df   :  { %4290 = vst [vmem:[#allocation9_spill] sm:$0xff] %v4070_v30 }
 0x1e0   :  { %v2743_v27 = vpop.f32.mrf.mxu1  ;;  %v2795_v32 = vpop.f32.mrf.mxu0 }
 0x1e2   :  { %v2744_v31 = vpop.f32.mrf.mxu1  ;;  %v2796_v38 = vpop.f32.mrf.mxu0 }
 0x1e3   :  { %v2745_v4 = vadd.f32 %v2744_v31, %v2743_v27 }
 0x1e4   :  { %v4074_v63 = vpop.f32.mrf.mxu1  ;;  %v2798_v42 = vpop.f32.mrf.mxu0 }
 0x1e5   :  { %v4077_v44 = vadd.f32 %v2745_v4, %v4017_v10 }
 0x1e6   :  { %v4079_v48 = vpop.f32.mrf.mxu1  ;;  %v2799_v49 = vpop.f32.mrf.mxu0 }
 0x1e8   :  { %v2749_v41 = vpop.f32.mrf.mxu1  ;;  %v2801_v12 = vpop.f32.mrf.mxu0 }
 0x1ea   :  { %v2750_v53 = vpop.f32.mrf.mxu1  ;;  %v2802_v39 = vpop.f32.mrf.mxu0 }
 0x1eb   :  { %v2751_v62 = vadd.f32 %v2750_v53, %v2749_v41 }
 0x1ec   :  { %v4081_v0 = vpop.f32.mrf.mxu1  ;;  %v4083_v56 = vpop.f32.mrf.mxu0 }
 0x1ed   :  { %v4086_v59 = vadd.f32 %v2751_v62, %v4026_v21 }
 0x1ee   :  { %v4088_v60 = vpop.f32.mrf.mxu1  ;;  %v4090_v61 = vpop.f32.mrf.mxu0 }
 0x1f0   :  { %v2755_v10 = vpop.f32.mrf.mxu1  ;;  %v4092_v46 = vpop.f32.mrf.mxu0 }
 0x1f2   :  { %v2756_v5 = vpop.f32.mrf.mxu1  ;;  %v4094_v18 = vpop.f32.mrf.mxu0 }
 0x1f3   :  { %v2757_v19 = vadd.f32 %v2756_v5, %v2755_v10 }
 0x1f4   :  { %v4096_v20 = vpop.f32.mrf.mxu1  ;;  %v4098_v22 = vpop.f32.mrf.mxu0 }
 0x1f5   :  { %v4101_v14 = vadd.f32 %v2757_v19, %v4035_v40 }
 0x1f6   :  { %v4103_v21 = vpop.f32.mrf.mxu1  ;;  %v4105_v27 = vpop.f32.mrf.mxu0 }
 0x1f8   :  { %v2761_v31 = vpop.f32.mrf.mxu1  ;;  %v4107_v53 = vpop.f32.mrf.mxu0 }
 0x1fa   :  { %v2762_v4 = vpop.f32.mrf.mxu1  ;;  %v4116_v7 = vpop.f32.mrf.mxu0 }
 0x1fb   :  { %v2763_v41 = vadd.f32 %v2762_v4, %v2761_v31 }
 0x1fc   :  { %v4109_v62 = vpop.f32.mrf.mxu1  ;;  %v4118_v24 = vpop.f32.mrf.mxu0 }
 0x1fd   :  { %4291 = vst [vmem:[#allocation10_spill] sm:$0xff] %v4109_v62  ;;  %v4112_v10 = vadd.f32 %v2763_v41, %v4044_v50 }
 0x1fe   :  { %v4114_v5 = vpop.f32.mrf.mxu1  ;;  %v4126_v4 = vpop.f32.mrf.mxu0 }
 0x1ff   :  { %4292 = vst [vmem:[#allocation11_spill] sm:$0xff] %v4112_v10  ;;  %4293 = vst [vmem:[#allocation12_spill] sm:$0xff] %v4114_v5 }
 0x200   :  { %v2767_v40 = vpop.f32.mrf.mxu1  ;;  %v4128_v10 = vpop.f32.mrf.mxu0 }
 0x202   :  { %v2768_v19 = vpop.f32.mrf.mxu1 }
 0x203   :  { %v2769_v30 = vadd.f32 %v2768_v19, %v2767_v40  ;;  %v2672_v19 = vadd.f32 %v4001_v25, %v3997_v43 }
 0x204   :  { %v4120_v36 = vpop.f32.mrf.mxu1 }
 0x205   :  { %4294 = vst [vmem:[#allocation13_spill] sm:$0xff] %v4120_v36  ;;  %v4122_v15 = vadd.f32 %v2769_v30, %v1868_v11  ;;  %v2797_v11 = vadd.f32 %v2796_v38, %v2795_v32  ;;  %v4138_v30 = vpop.f32.mrf.mxu0  ;;  %v2678_v32 = vadd.f32 %v4010_v45, %v4006_v2  ;;  %v2803_v38 = vadd.f32 %v2802_v39, %v2801_v12 }
 0x206   :  { %v4124_v31 = vpop.f32.mrf.mxu1  ;;  %v2806_v45 = vadd.f32 %v4090_v61, %v4083_v56  ;;  %v1742_v61 = vadd.f32 %v4003_v47, %v3991_v28 }
 0x207   :  { %4295 = vst [vmem:[#allocation14_spill] sm:$0xff] %v4122_v15  ;;  %4296 = vst [vmem:[#allocation15_spill] sm:$0xff] %v4124_v31  ;;  %v1726_v31 = vadd.f32 %v3978_v37, %v3991_v28 }
 0x208   :  { %v2773_v1 = vpop.f32.mrf.mxu1 }
 0x209   :  { %v1823_v36 = vadd.f32 %v2672_v19, %v1726_v31 }
 0x20a   :  { %v2774_v50 = vpop.f32.mrf.mxu1 }
 0x20b   :  { %v2775_v41 = vadd.f32 %v2774_v50, %v2773_v1  ;;  %v2736_v1 = vadd.f32 %v4060_v9, %v4053_v57  ;;  %v1734_v57 = vadd.f32 %v3986_v33, %v3991_v28 }
 0x20c   :  { %v4130_v5 = vpop.f32.mrf.mxu1 }
 0x20d   :  { %4297 = vst [vmem:[#allocation16_spill] sm:$0xff] %v4130_v5  ;;  %v4132_v62 = vadd.f32 %v2775_v41, %v1876_v16  ;;  %v2014_v16 = vadd.f32 %v2797_v11, %v4056_v52  ;;  %v2800_v41 = vadd.f32 %v2799_v49, %v2798_v42  ;;  %v1920_v43 = vadd.f32 %v2736_v1, %v1823_v36 }
 0x20e   :  { %v4134_v40 = vpop.f32.mrf.mxu1  ;;  %v1831_v36 = vadd.f32 %v2678_v32, %v1734_v57 }
 0x20f   :  { %4298 = vst [vmem:[#allocation17_spill] sm:$0xff] %v4132_v62  ;;  %4299 = vst [vmem:[#allocation18_spill] sm:$0xff] %v4134_v40  ;;  %v4145_v40 = vpop.f32.mrf.mxu0  ;;  %v2017_v37 = vadd.f32 %v2800_v41, %v1920_v43  ;;  %v2748_v41 = vadd.f32 %v4079_v48, %v4074_v63  ;;  %v2690_v48 = vadd.f32 %v4028_v6, %v4024_v51 }
 0x210   :  { %v2859_v15 = vpop.f32.mrf.mxu1 }
 0x211   :  { %v4151_v9 = vpop.f32.mrf.mxu0 }
 0x212   :  { %v2860_v50 = vpop.f32.mrf.mxu1 }
 0x213   :  { %v2861_v62 = vadd.f32 %v2860_v50, %v2859_v15  ;;  %v2742_v15 = vadd.f32 %v4072_v23, %v4065_v26  ;;  %v4158_v33 = vpop.f32.mrf.mxu0 }
 0x214   :  { %v2862_v5 = vpop.f32.mrf.mxu1 }
 0x215   :  { %v2111_v25 = vadd.f32 %v2861_v62, %v2014_v16  ;;  %v2022_v62 = vadd.f32 %v2803_v38, %v4068_v17  ;;  %v2809_v17 = vadd.f32 %v4094_v18, %v4092_v46  ;;  %v4166_v50 = vpop.f32.mrf.mxu0  ;;  %v2812_v18 = vadd.f32 %v4105_v27, %v4098_v22 }
 0x216   :  { %v2863_v58 = vpop.f32.mrf.mxu1  ;;  %v1750_v27 = vadd.f32 %v4012_v55, %v3991_v28 }
 0x217   :  { %v2864_v54 = vadd.f32 %v2863_v58, %v2862_v5  ;;  %v2189_v42 = vmul.f32 0.01, %v2111_v25  ;;  %vm2173_vm1 = vcmp.ge.f32.partialorder %v2111_v25, 0.0  ;;  %v1928_v5 = vadd.f32 %v2742_v15, %v1831_v36  ;;  %v4173_v38 = vpop.f32.mrf.mxu0 }
 0x218   :  { %v2865_v52 = vpop.f32.mrf.mxu1  ;;  %v1847_v51 = vadd.f32 %v2690_v48, %v1750_v27  ;;  %v4302_v48 = vld [vmem:[#allocation10_spill] sm:$0xff] }
 0x219   :  { %v2114_v49 = vadd.f32 %v2864_v54, %v2017_v37  ;;  %v2205_v19 = vsel %vm2173_vm1, %v2111_v25, %v2189_v42  ;;  %v2684_v54 = vadd.f32 %v4019_v13, %v4015_v8  ;;  %v2025_v1 = vadd.f32 %v2806_v45, %v1928_v5 }
 0x21a   :  { %v2866_v2 = vpop.f32.mrf.mxu1  ;;  %v2030_v13 = vadd.f32 %v2809_v17, %v4077_v44  ;;  %v2815_v44 = vadd.f32 %v4116_v7, %v4107_v53  ;;  %v2754_v45 = vadd.f32 %v4088_v60, %v4081_v0  ;;  %v2818_v53 = vadd.f32 %v4126_v4, %v4118_v24 }
 0x21b   :  { %vm2174_vm2 = vcmp.ge.f32.partialorder %v2114_v49, 0.0  ;;  %v2190_v58 = vmul.f32 0.01, %v2114_v49  ;;  %v2867_v12 = vadd.f32 %v2866_v2, %v2865_v52  ;;  %v1839_v8 = vadd.f32 %v2684_v54, %v1742_v61 }
 0x21c   :  { %v2868_v39 = vpop.f32.mrf.mxu1  ;;  %v2038_v6 = vadd.f32 %v2815_v44, %v4086_v59  ;;  %v2696_v0 = vadd.f32 %v4037_v35, %v4033_v34  ;;  %v2821_v59 = vadd.f32 %v4138_v30, %v4128_v10  ;;  %v1758_v24 = vadd.f32 %v4021_v3, %v3991_v28  ;;  %v4303_v44 = vld [vmem:[#allocation12_spill] sm:$0xff] }
 0x21d   :  { %v2119_v31 = vadd.f32 %v2867_v12, %v2022_v62  ;;  %v2206_v26 = vsel %vm2174_vm2, %v2114_v49, %v2190_v58  ;;  %v1936_v57 = vadd.f32 %v2748_v41, %v1839_v8  ;;  %v4181_v62 = vpop.f32.mrf.mxu0  ;;  %v2760_v61 = vadd.f32 %v4103_v21, %v4096_v20  ;;  %v4300_v20 = vld [vmem:[#allocation4_spill] sm:$0xff] }
 0x21e   :  { %v2869_v23 = vpop.f32.mrf.mxu1  ;;  %v2221_v11 = vpack.c.bf16 %v2206_v26, %v2205_v19  ;;  %v1944_v19 = vadd.f32 %v2754_v45, %v1847_v51  ;;  %v2046_v34 = vadd.f32 %v2821_v59, %v4101_v14  ;;  %v2824_v10 = vadd.f32 %v4151_v9, %v4145_v40  ;;  %v4301_v40 = vld [vmem:[#allocation2_spill] sm:$0xff]  ;;  %v4307_v59 = vld [vmem:[#allocation3_spill] sm:$0xff] }
 0x21f   :  { %v2870_v56 = vadd.f32 %v2869_v23, %v2868_v39  ;;  %v2191_v43 = vmul.f32 0.01, %v2119_v31  ;;  %vm2175_vm3 = vcmp.ge.f32.partialorder %v2119_v31, 0.0  ;;  %v2033_v36 = vadd.f32 %v2812_v18, %v1936_v57  ;;  %v2831_v5 = vpop.f32.mrf.mxu0 }
 0x220   :  { %v2871_v16 = vpop.f32.mrf.mxu1  ;;  %2939 = vmatprep.mubr.bf16.mxu0 %v2221_v11  ;;  %v2041_v11 = vadd.f32 %v2818_v53, %v1944_v19  ;;  %v2702_v21 = vadd.f32 %v4300_v20, %v4042_v29  ;;  %v2827_v14 = vadd.f32 %v4166_v50, %v4158_v33  ;;  %v1766_v9 = vadd.f32 %v4301_v40, %v3991_v28  ;;  %v4304_v29 = vld [vmem:[#allocation11_spill] sm:$0xff] }
 0x221   :  { %v2122_v25 = vadd.f32 %v2870_v56, %v2025_v1  ;;  %v2207_v52 = vsel %vm2175_vm3, %v2119_v31, %v2191_v43  ;;  %v2832_v4 = vpop.f32.mrf.mxu0  ;;  %v1855_v43 = vadd.f32 %v2696_v0, %v1758_v24  ;;  %v2830_v50 = vadd.f32 %v4181_v62, %v4173_v38 }
 0x222   :  { %v2872_v46 = vpop.f32.mrf.mxu1  ;;  %v2054_v27 = vadd.f32 %v2827_v14, %v4304_v29  ;;  %v2833_v19 = vadd.f32 %v2832_v4, %v2831_v5  ;;  %v1774_v38 = vadd.f32 %v4307_v59, %v3991_v28 }
 0x223   :  { %vm2176_vm4 = vcmp.ge.f32.partialorder %v2122_v25, 0.0  ;;  %v2192_v32 = vmul.f32 0.01, %v2122_v25  ;;  %v2873_v47 = vadd.f32 %v2872_v46, %v2871_v16  ;;  %v2834_v3 = vpop.f32.mrf.mxu0 }
 0x224   :  { %v2874_v37 = vpop.f32.mrf.mxu1 }
 0x225   :  { %v2208_v15 = vsel %vm2176_vm4, %v2122_v25, %v2192_v32  ;;  %v2127_v63 = vadd.f32 %v2873_v47, %v2030_v13  ;;  %v1952_v13 = vadd.f32 %v2760_v61, %v1855_v43 }
 0x226   :  { %v2222_v42 = vpack.c.bf16 %v2208_v15, %v2207_v52  ;;  %v2875_v49 = vpop.f32.mrf.mxu1  ;;  %v2835_v15 = vpop.f32.mrf.mxu0 }
 0x227   :  { %v2876_v22 = vadd.f32 %v2875_v49, %v2874_v37  ;;  %v2193_v58 = vmul.f32 0.01, %v2127_v63  ;;  %vm2177_vm5 = vcmp.ge.f32.partialorder %v2127_v63, 0.0  ;;  %v2049_v57 = vadd.f32 %v2824_v10, %v1952_v13 }
 0x228   :  { %v2877_v2 = vpop.f32.mrf.mxu1  ;;  %2940 = vmatmul.mubr.bf16.vlgmr.msra.gmra.mxu0 %v2222_v42  ;;  %v2766_v42 = vadd.f32 %v4303_v44, %v4302_v48  ;;  %v2836_v4 = vadd.f32 %v2835_v15, %v2834_v3  ;;  %v4315_v15 = vld [vmem:[#allocation18_spill] sm:$0xff] }
 0x229   :  { %v2130_v12 = vadd.f32 %v2876_v22, %v2033_v36  ;;  %v2209_v54 = vsel %vm2177_vm5, %v2127_v63, %v2193_v58  ;;  %v1863_v22 = vadd.f32 %v2702_v21, %v1766_v9  ;;  %v2837_v58 = vpop.f32.mrf.mxu0  ;;  %v4314_v9 = vld [vmem:[#allocation16_spill] sm:$0xff] }
 0x22a   :  { %v2878_v7 = vpop.f32.mrf.mxu1 }
 0x22b   :  { %vm2178_vm6 = vcmp.ge.f32.partialorder %v2130_v12, 0.0  ;;  %v2194_v39 = vmul.f32 0.01, %v2130_v12  ;;  %v2879_v55 = vadd.f32 %v2878_v7, %v2877_v2  ;;  %v1960_v51 = vadd.f32 %v2766_v42, %v1863_v22  ;;  %v2838_v62 = vpop.f32.mrf.mxu0 }
 0x22c   :  { %v2880_v31 = vpop.f32.mrf.mxu1  ;;  %v2839_v20 = vadd.f32 %v2838_v62, %v2837_v58 }
 0x22d   :  { %v2135_v26 = vadd.f32 %v2879_v55, %v2038_v6  ;;  %v2210_v17 = vsel %vm2178_vm6, %v2130_v12, %v2194_v39  ;;  %v4305_v39 = vld [vmem:[#allocation6_spill] sm:$0xff]  ;;  %v4306_v55 = vld [vmem:[#allocation7_spill] sm:$0xff] }
 0x22e   :  { %v2881_v60 = vpop.f32.mrf.mxu1  ;;  %v2223_v23 = vpack.c.bf16 %v2210_v17, %v2209_v54  ;;  %v2057_v17 = vadd.f32 %v2830_v50, %v1960_v51 }
 0x22f   :  { %v2882_v1 = vadd.f32 %v2881_v60, %v2880_v31  ;;  %v2195_v16 = vmul.f32 0.01, %v2135_v26  ;;  %vm2179_vm7 = vcmp.ge.f32.partialorder %v2135_v26, 0.0  ;;  %v2708_v31 = vadd.f32 %v4306_v55, %v4305_v39 }
 0x230   :  { %v2883_v56 = vpop.f32.mrf.mxu1  ;;  %2943 = vmatprep.mubr.bf16.mxu0 %v2223_v23  ;;  %v4308_v23 = vld [vmem:[#allocation13_spill] sm:$0xff] }
 0x231   :  { %v2138_v41 = vadd.f32 %v2882_v1, %v2041_v11  ;;  %v2211_v46 = vsel %vm2179_vm7, %v2135_v26, %v2195_v16  ;;  %v4309_v11 = vld [vmem:[#allocation15_spill] sm:$0xff]  ;;  %v1871_v61 = vadd.f32 %v2708_v31, %v1774_v38  ;;  %v4310_v16 = vld [vmem:[#allocation14_spill] sm:$0xff] }
 0x232   :  { %v2884_v35 = vpop.f32.mrf.mxu1  ;;  %v2772_v1 = vadd.f32 %v4309_v11, %v4308_v23 }
 0x233   :  { %vm2180_vm8 = vcmp.ge.f32.partialorder %v2138_v41, 0.0  ;;  %v2196_v30 = vmul.f32 0.01, %v2138_v41  ;;  %v2885_v25 = vadd.f32 %v2884_v35, %v2883_v56  ;;  %v2840_v35 = vpop.f32.mrf.mxu0 }
 0x234   :  { %v2886_v8 = vpop.f32.mrf.mxu1 }
 0x235   :  { %v2212_v18 = vsel %vm2180_vm8, %v2138_v41, %v2196_v30  ;;  %v2143_v32 = vadd.f32 %v2885_v25, %v2046_v34  ;;  %v2062_v41 = vadd.f32 %v2833_v19, %v4310_v16  ;;  %v1968_v30 = vadd.f32 %v2772_v1, %v1871_v61 }
 0x236   :  { %v2887_v47 = vpop.f32.mrf.mxu1  ;;  %v2224_v37 = vpack.c.bf16 %v2212_v18, %v2211_v46  ;;  %v4311_v46 = vld [vmem:[#allocation8_spill] sm:$0xff]  ;;  %v4312_v18 = vld [vmem:[#allocation9_spill] sm:$0xff] }
 0x237   :  { %v2888_v52 = vadd.f32 %v2887_v47, %v2886_v8  ;;  %v2197_v49 = vmul.f32 0.01, %v2143_v32  ;;  %vm2181_vm9 = vcmp.ge.f32.partialorder %v2143_v32, 0.0  ;;  %v2065_v47 = vadd.f32 %v2836_v4, %v1968_v30 }
 0x238   :  { %v2889_v63 = vpop.f32.mrf.mxu1  ;;  %2944 = vmatmul.mubr.bf16.gmra.mxu0 %v2224_v37 }
 0x239   :  { %v2146_v36 = vadd.f32 %v2888_v52, %v2049_v57  ;;  %v2213_v7 = vsel %vm2181_vm9, %v2143_v32, %v2197_v49  ;;  %v2714_v32 = vadd.f32 %v4312_v18, %v4311_v46  ;;  %v4313_v57 = vld [vmem:[#allocation5_spill] sm:$0xff]  ;;  %v2841_v52 = vpop.f32.mrf.mxu0 }
 0x23a   :  { %v2890_v33 = vpop.f32.mrf.mxu1  ;;  %v1782_v3 = vadd.f32 %v4313_v57, %v3991_v28  ;;  %v4316_v49 = vld [vmem:[#allocation17_spill] sm:$0xff]  ;;  %v2842_v29 = vadd.f32 %v2841_v52, %v2840_v35 }
 0x23b   :  { %vm2182_vm10 = vcmp.ge.f32.partialorder %v2146_v36, 0.0  ;;  %v2198_v2 = vmul.f32 0.01, %v2146_v36  ;;  %v2891_v45 = vadd.f32 %v2890_v33, %v2889_v63  ;;  %v2778_v63 = vadd.f32 %v4315_v15, %v4314_v9 }
 0x23c   :  { %v2892_v12 = vpop.f32.mrf.mxu1  ;;  %v1879_v42 = vadd.f32 %v2714_v32, %v1782_v3 }
 0x23d   :  { %v2151_v6 = vadd.f32 %v2891_v45, %v2054_v27  ;;  %v2214_v53 = vsel %vm2182_vm10, %v2146_v36, %v2198_v2  ;;  %v2070_v36 = vadd.f32 %v2839_v20, %v4316_v49 }
 0x23e   :  { %v2893_v26 = vpop.f32.mrf.mxu1  ;;  %v2225_v54 = vpack.c.bf16 %v2214_v53, %v2213_v7  ;;  %v1976_v2 = vadd.f32 %v2778_v63, %v1879_v42 }
 0x23f   :  { %v2894_v0 = vadd.f32 %v2893_v26, %v2892_v12  ;;  %v2199_v24 = vmul.f32 0.01, %v2151_v6  ;;  %vm2183_vm11 = vcmp.ge.f32.partialorder %v2151_v6, 0.0 }
 0x240   :  { %v2895_v60 = vpop.f32.mrf.mxu1  ;;  %2947 = vmatprep.mubr.bf16.mxu0 %v2225_v54  ;;  %v2578_v54 = vld [vmem:[%s4281_s6] ss:$0 sm:$0xff] }
 0x241   :  { %v2154_v56 = vadd.f32 %v2894_v0, %v2057_v17  ;;  %v2215_v25 = vsel %vm2183_vm11, %v2151_v6, %v2199_v24  ;;  %v2073_v6 = vadd.f32 %v2842_v29, %v1976_v2 }
 0x242   :  { %v2896_v5 = vpop.f32.mrf.mxu1 }
 0x243   :  { %vm2184_vm12 = vcmp.ge.f32.partialorder %v2154_v56, 0.0  ;;  %v2200_v43 = vmul.f32 0.01, %v2154_v56  ;;  %v2897_v34 = vadd.f32 %v2896_v5, %v2895_v60 }
 0x244   :  { %v2898_v10 = vpop.f32.mrf.mxu1 }
 0x245   :  { %v2216_v8 = vsel %vm2184_vm12, %v2154_v56, %v2200_v43  ;;  %v2159_v13 = vadd.f32 %v2897_v34, %v2062_v41 }
 0x246   :  { %v2899_v21 = vpop.f32.mrf.mxu1  ;;  %v2226_v14 = vpack.c.bf16 %v2216_v8, %v2215_v25 }
 0x247   :  { %v2900_v37 = vadd.f32 %v2899_v21, %v2898_v10  ;;  %v2201_v48 = vmul.f32 0.01, %v2159_v13  ;;  %vm2185_vm13 = vcmp.ge.f32.partialorder %v2159_v13, 0.0 }
 0x248   :  { %v2901_v40 = vpop.f32.mrf.mxu1  ;;  %2948 = vmatmul.mubr.bf16.gmra.mxu0 %v2226_v14 }
 0x249   :  { %v2162_v44 = vadd.f32 %v2900_v37, %v2065_v47  ;;  %v2217_v45 = vsel %vm2185_vm13, %v2159_v13, %v2201_v48 }
 0x24a   :  { %v2902_v22 = vpop.f32.mrf.mxu1 }
 0x24b   :  { %vm2186_vm14 = vcmp.ge.f32.partialorder %v2162_v44, 0.0  ;;  %v2202_v27 = vmul.f32 0.01, %v2162_v44  ;;  %v2903_v33 = vadd.f32 %v2902_v22, %v2901_v40 }
 0x24c   :  { %v2904_v50 = vpop.f32.mrf.mxu1 }
 0x24d   :  { %v2167_v28 = vadd.f32 %v2903_v33, %v2070_v36  ;;  %v2218_v58 = vsel %vm2186_vm14, %v2162_v44, %v2202_v27 }
 0x24e   :  { %v2905_v12 = vpop.f32.mrf.mxu1  ;;  %v2227_v51 = vpack.c.bf16 %v2218_v58, %v2217_v45 }
 0x24f   :  { %v2906_v7 = vadd.f32 %v2905_v12, %v2904_v50  ;;  %v2203_v53 = vmul.f32 0.01, %v2167_v28  ;;  %vm2187_vm15 = vcmp.ge.f32.partialorder %v2167_v28, 0.0 }
 0x250   :  { %2951 = vmatprep.mubr.bf16.mxu0 %v2227_v51 }
 0x251   :  { %v2170_v39 = vadd.f32 %v2906_v7, %v2073_v6  ;;  %v2219_v31 = vsel %vm2187_vm15, %v2167_v28, %v2203_v53 }
 0x253   :  { %vm2188_vm0 = vcmp.ge.f32.partialorder %v2170_v39, 0.0  ;;  %v2204_v55 = vmul.f32 0.01, %v2170_v39 }
 0x255   :  { %v2220_v19 = vsel %vm2188_vm0, %v2170_v39, %v2204_v55 }
 0x256   :  { %v2228_v26 = vpack.c.bf16 %v2220_v19, %v2219_v31 }
 0x258   :  { %2952 = vmatmul.mubr.bf16.gmra.mxu0 %v2228_v26 }
 0x2e8   :  { %v2941_v17 = vpop.f32.mrf.mxu0 }
 0x2e9   :  { %v2343_v0 = vadd.f32 %v2941_v17, %v2578_v54 }
 0x2ea   :  { %v2334_v59 = vpop.f32.mrf.mxu0 }
 0x2eb   :  { %2399 = vst [vmem:[%s4282_s7 + $0x10] sm:$0xff] %v2343_v0  ;;  %v2335_v38 = vadd.f32 %v2578_v54, %v2334_v59 }
 0x2ec   :  { %v2942_v62 = vpop.f32.mrf.mxu0 }
 0x2ed   :  { %2397 = vst [vmem:[%s4282_s7] sm:$0xff] %v2335_v38  ;;  %v2346_v60 = vadd.f32 %v2942_v62, %v2578_v54 }
 0x2ee   :  { %v2337_v23 = vpop.f32.mrf.mxu0 }
 0x2ef   :  { %2400 = vst [vmem:[%s4282_s7 + $0x18] sm:$0xff] %v2346_v60  ;;  %v2338_v11 = vadd.f32 %v2578_v54, %v2337_v23 }
 0x2f1   :  { %2398 = vst [vmem:[%s4282_s7 + $0x8] sm:$0xff] %v2338_v11 }
 0x2f8   :  { %v2945_v1 = vpop.f32.mrf.mxu0 }
 0x2f9   :  { %v2359_v24 = vadd.f32 %v2945_v1, %v2578_v54 }
 0x2fa   :  { %v2350_v56 = vpop.f32.mrf.mxu0 }
 0x2fb   :  { %2403 = vst [vmem:[%s4282_s7 + $0x30] sm:$0xff] %v2359_v24  ;;  %v2351_v61 = vadd.f32 %v2578_v54, %v2350_v56 }
 0x2fc   :  { %v2946_v16 = vpop.f32.mrf.mxu0 }
 0x2fd   :  { %2401 = vst [vmem:[%s4282_s7 + $0x20] sm:$0xff] %v2351_v61  ;;  %v2362_v41 = vadd.f32 %v2946_v16, %v2578_v54 }
 0x2fe   :  { %v2353_v5 = vpop.f32.mrf.mxu0 }
 0x2ff   :  { %2404 = vst [vmem:[%s4282_s7 + $0x38] sm:$0xff] %v2362_v41  ;;  %v2354_v4 = vadd.f32 %v2578_v54, %v2353_v5 }
 0x301   :  { %2402 = vst [vmem:[%s4282_s7 + $0x28] sm:$0xff] %v2354_v4 }
 0x308   :  { %v2949_v43 = vpop.f32.mrf.mxu0 }
 0x309   :  { %v2375_v34 = vadd.f32 %v2949_v43, %v2578_v54 }
 0x30a   :  { %v2366_v35 = vpop.f32.mrf.mxu0 }
 0x30b   :  { %2407 = vst [vmem:[%s4282_s7 + $0x50] sm:$0xff] %v2375_v34  ;;  %v2367_v10 = vadd.f32 %v2578_v54, %v2366_v35 }
 0x30c   :  { %v2950_v30 = vpop.f32.mrf.mxu0 }
 0x30d   :  { %2405 = vst [vmem:[%s4282_s7 + $0x40] sm:$0xff] %v2367_v10  ;;  %v2378_v25 = vadd.f32 %v2950_v30, %v2578_v54 }
 0x30e   :  { %v2369_v8 = vpop.f32.mrf.mxu0 }
 0x30f   :  { %2408 = vst [vmem:[%s4282_s7 + $0x58] sm:$0xff] %v2378_v25  ;;  %v2370_v13 = vadd.f32 %v2578_v54, %v2369_v8 }
 0x311   :  { %2406 = vst [vmem:[%s4282_s7 + $0x48] sm:$0xff] %v2370_v13 }
 0x318   :  { %v2953_v46 = vpop.f32.mrf.mxu0 }
 0x319   :  { %v2391_v18 = vadd.f32 %v2953_v46, %v2578_v54 }
 0x31a   :  { %v2382_v32 = vpop.f32.mrf.mxu0 }
 0x31b   :  { %2411 = vst [vmem:[%s4282_s7 + $0x70] sm:$0xff] %v2391_v18  ;;  %v2383_v20 = vadd.f32 %v2578_v54, %v2382_v32 }
 0x31c   :  { %v2954_v21 = vpop.f32.mrf.mxu0 }
 0x31d   :  { %2409 = vst [vmem:[%s4282_s7 + $0x60] sm:$0xff] %v2383_v20  ;;  %v2394_v14 = vadd.f32 %v2954_v21, %v2578_v54 }
 0x31e   :  { %v2385_v47 = vpop.f32.mrf.mxu0 }
 0x31f   :  { %2412 = vst [vmem:[%s4282_s7 + $0x78] sm:$0xff] %v2394_v14  ;;  %v2386_v37 = vadd.f32 %v2578_v54, %v2385_v47 }
 0x321   :  { %2410 = vst [vmem:[%s4282_s7 + $0x68] sm:$0xff] %v2386_v37 }

// kernel: single_stage_detector_forward.5
= control target key start
LH: loop header
LB: loop body
LE: loop exit
PB: predicated region body
PF: predicated region fallthrough
CT: control target
= control target key end

     0   :  { %vm63_vm0 = vcmask 162816   ;;  %s211_s0 = inlined_call_operand.vmem [shape: f32[16,1], index: 0, kind: input, shape index: {}]   ;;  %s212_s1 = inlined_call_operand.vmem [shape: f32[16,1], index: 1, kind: input, shape index: {}]   ;;  %s213_s2 = inlined_call_operand.vmem [shape: f32[8,4], index: 2, kind: input, shape index: {}]   ;;  %s214_s3 = inlined_call_operand.vmem [shape: f32[8,4], index: 3, kind: input, shape index: {}]   ;;  %s215_s4 = inlined_call_operand.vmem [shape: f32[8,20], index: 4, kind: input, shape index: {}]   ;;  %s216_s5 = inlined_call_operand.vmem [shape: f32[8,20], index: 5, kind: input, shape index: {}]   ;;  %s217_s6 = inlined_call_operand.hbm [shape: f32[1,128], index: 6, kind: output, shape index: {}]  }
   0x1   :  { %v62_v0 = vld [vmem:[%s215_s4] sm:$0xff] }
   0x2   :  { %11 = vsyncpa [#allocation3], 0  ;;  %v64_v1 = vsel %vm63_vm0, %v62_v0, -inf  ;;  %v76_v2 = vld [vmem:[%s216_s5] sm:$0xff]  ;;  %v25_v11 = vld [vmem:[%s211_s0 + $0x8] sm:$0xff]  ;;  %vm32_vm1 = vcmask 7168  }
   0x3   :  { %65 = vmax.xlane.f32.xlu0 %v64_v1  ;;  %v77_v3 = vmul.f32 %v76_v2, %v62_v0  ;;  %v24_v10 = vld [vmem:[%s211_s0] sm:$0xff]  ;;  %v27_v13 = vld [vmem:[%s212_s1 + $0x8] sm:$0xff]  ;;  %vm50_vm2 = vcmask 31744   ;;  %s145_s14 = smov [#allocation2]  }
   0x4   :  { %v26_v12 = vld [vmem:[%s212_s1] sm:$0xff]  ;;  %v29_v17 = vsub.f32 %v25_v11, %v27_v13  ;;  %s104_s15 = sshll.u32 %s145_s14, 4  ;;  %s105_s15 = int_to_ptr.vmem [resolvable:$true] %s104_s15 }
   0x5   :  { %v78_v4 = vsel %vm63_vm0, %v77_v3, 0.0  ;;  %v28_v14 = vsub.f32 %v24_v10, %v26_v12  ;;  %v46_v15 = vld [vmem:[%s213_s2] sm:$0xff]  ;;  %s123_s17 = scalar_lea.vmem %s105_s15, 16  ;;  %s127_s18 = scalar_lea.vmem %s105_s15, 32 }
   0x6   :  { %79 = vadd.xlane.f32.xlu1 %v78_v4  ;;  %v47_v16 = vld [vmem:[%s214_s3] sm:$0xff]  ;;  %v31_v20 = vmul.f32 %v29_v17, %v29_v17  ;;  %p124_p0 = scmp.ne.s32.totalorder %s105_s15, %s123_s17  ;;  %p128_p1 = scmp.lt.s32.totalorder %s105_s15, %s105_s15 }
   0x7   :  { %v48_v18 = vsub.f32 %v46_v15, %v47_v16  ;;  %v30_v19 = vmul.f32 %v28_v14, %v28_v14  ;;  %p129_p2 = scmp.lt.s32.totalorder %s127_s18, %s123_s17 }
   0x8   :  { %v34_v23 = vsel %vm32_vm1, %v31_v20, 0.0 }
   0x9   :  { %v49_v21 = vmul.f32 %v48_v18, %v48_v18  ;;  %v33_v22 = vsel %vm32_vm1, %v30_v19, 0.0  ;;  %p130_p3 = por %p129_p2, %p128_p1 }
   0xa   :  { %v35_v25 = vadd.f32 %v34_v23, %v33_v22 }
   0xb   :  { %v51_v24 = vsel %vm50_vm2, %v49_v21, 0.0  ;;  %p131_p4 = pnand %p130_p3, %p124_p0 }
   0xc   :  { %36 = vadd.xlane.f32.xlu1 %v35_v25 }
  0x8c   :  { %v66_v5 = vpop.xlane.xlu0 %65 }
  0x8d   :  { %v67_v6 = vsub.f32 %v62_v0, %v66_v5 }
  0x8f   :  { %v68_v7 = vmul.f32 1.442695, %v67_v6  ;;  %v80_v29 = vpop.xlane.xlu1 %79 }
  0x91   :  { %119 = vpow2.f32 %v68_v7 }
  0x95   :  { %v37_v35 = vpop.xlane.xlu1 %36 }
  0x96   :  { %v38_v36 = vrot.slane %v37_v35, 4 }
  0x98   :  { %v39_v38 = vadd.f32 %v38_v36, %v37_v35 }
  0x9a   :  { %v40_v40 = vrot.slane %v39_v38, 2 }
  0x9c   :  { %v41_v42 = vadd.f32 %v40_v40, %v39_v38 }
  0x9e   :  { %v120_v8 = vpop.eup %119  ;;  %v42_v44 = vrot.slane %v41_v42, 1 }
  0x9f   :  { %v70_v9 = vsel %vm63_vm0, %v120_v8, 0.0 }
  0xa0   :  { %71 = vadd.xlane.f32.xlu0 %v70_v9  ;;  %v43_v46 = vadd.f32 %v42_v44, %v41_v42 }
  0xa2   :  { %112 = vpush %v43_v46 }
  0xa4   :  { %52 = vadd.xlane.f32.xlu0 %v51_v24 }
  0xd3   :  { %s113_s0 = spop %112 }
  0xd4   :  { %s45_s2 = smul.f32 0.0625, %s113_s0 }
 0x129   :  { %v72_v26 = vpop.xlane.xlu0 %71 }
 0x12a   :  { %121 = vlog2.f32 %v72_v26 }
 0x12d   :  { %v53_v33 = vpop.xlane.xlu0 %52 }
 0x12e   :  { %v54_v34 = vrot.slane %v53_v33, 4 }
 0x130   :  { %v55_v37 = vadd.f32 %v54_v34, %v53_v33 }
 0x132   :  { %v56_v39 = vrot.slane %v55_v37, 2 }
 0x134   :  { %v57_v41 = vadd.f32 %v56_v39, %v55_v37 }
 0x136   :  { %v58_v43 = vrot.slane %v57_v41, 1 }
 0x137   :  { %v122_v27 = vpop.eup %121 }
 0x138   :  { %v74_v28 = vmul.f32 0.6931472, %v122_v27  ;;  %v59_v45 = vadd.f32 %v58_v43, %v57_v41 }
 0x13a   :  { %v75_v30 = vadd.f32 %v74_v28, %v66_v5  ;;  %114 = vpush %v59_v45 }
 0x13c   :  { %v81_v31 = vsub.f32 %v75_v30, %v80_v29 }
 0x13e   :  { %v82_v32 = vsel %vm32_vm1, %v81_v31, 0.0 }
 0x13f   :  { %83 = vadd.xlane.f32.xlu1 %v82_v32 }
 0x16b   :  { %s115_s1 = spop %114 }
 0x16c   :  { %s61_s3 = smul.f32 0.125, %s115_s1 }
 0x16e   :  { %s93_s11 = sadd.f32 %s61_s3, %s45_s2 }
 0x1c8   :  { %v84_v47 = vpop.xlane.xlu1 %83 }
 0x1c9   :  { %v85_v48 = vrot.slane %v84_v47, 4 }
 0x1cb   :  { %v86_v49 = vadd.f32 %v85_v48, %v84_v47 }
 0x1cd   :  { %v87_v50 = vrot.slane %v86_v49, 2 }
 0x1cf   :  { %v88_v51 = vadd.f32 %v87_v50, %v86_v49 }
 0x1d1   :  { %v89_v52 = vrot.slane %v88_v51, 1 }
 0x1d3   :  { %v90_v53 = vadd.f32 %v89_v52, %v88_v51 }
 0x1d5   :  { %116 = vpush %v90_v53 }
 0x206   :  { %s117_s12 = spop %116 }
 0x207   :  { %s92_s13 = smul.f32 27.5625, %s117_s12 }
 0x209   :  { %s94_s16 = sadd.f32 %s93_s11, %s92_s13 }
 0x20b   :  { %v95_v54 = vstv %s94_s16 }
 0x20c   :  { %97 = vst [vmem:[#allocation2] sm:$0x1] %v95_v54 }
 0x20d   :  { %134 = shalt.err (!%p131_p4)
}
 0x20e   :  { %107 = dma.vmem_to_hbm [thread:$0]  %s105_s15, 16, %s217_s6, [#allocation3]  }
 0x20f   :  { %143 = dma.done.wait [#allocation3], 16  }
 0x210   :  { %144 = vsyncadd [#allocation3], 4294967280 }
 0x211   :  { %111 = vsyncpa [#allocation3], 1 }

</bundles_post_ra>
